<compile_context>
chip_gen: v7x
topology: tpu7x:2x2x1
jax: 0.10.0
libtpu: 0.0.40
codegen_flags: <defaults>
</compile_context>

<pallas_src>
import functools

import jax
import jax.numpy as jnp
from jax import lax
from jax.experimental import pallas as pl
from jax.experimental.pallas import tpu as pltpu
import numpy as np

_NEG_BIG = -1e30          # poison value for padded vocab columns
_ROW_ALIGN = 256          # row-tile granularity (multiple of 8 sublanes, MXU friendly)


def _round_up(x: int, m: int) -> int:
    return ((x + m - 1) // m) * m


def _choose_tile_n(n: int, requested: int) -> int:
    """256-aligned row tile; capped so that (when n allows) there are >= 2 grid
    blocks, keeping both v7x TensorCores busy under dimension_semantics=parallel."""
    t = max(_ROW_ALIGN, _round_up(requested, _ROW_ALIGN))
    two_block = _round_up(pl.cdiv(n, 2), _ROW_ALIGN)
    return min(t, max(_ROW_ALIGN, two_block))


def pad_embedding_table(emb_table):
    """One-time table prep — call OUTSIDE the jitted train step.

    Zero-pads (V, V) -> (VP, VP) with VP = round_up(V, 128) and poisons the
    padded *columns* of the real rows to -1e30, so the in-kernel log-sum-exp
    needs no vocab mask.  Padded rows stay 0 (never selected by the one-hot)."""
    V = emb_table.shape[0]
    VP = _round_up(max(V, 8), 128)
    emb_p = jnp.zeros((VP, VP), jnp.float32)
    emb_p = emb_p.at[:V, :V].set(emb_table.astype(jnp.float32))
    if VP > V:
        emb_p = emb_p.at[:V, V:].set(jnp.float32(_NEG_BIG))
    return emb_p


def bigram_kernel(tok_ref, emb_ref, *out_refs, n_true, compute_logits,
                  compute_loss, mask_rows):
    """One row-tile: one-hot gather of embedding rows on the MXU, optional
    lane-dense logits store, optional per-block cross-entropy partial sum."""
    tile_n = tok_ref.shape[0]
    vp = emb_ref.shape[1]

    refs = list(out_refs)
    logits_ref = refs.pop(0) if compute_logits else None
    loss_ref = refs.pop(0) if compute_loss else None

    # one_hot(idx) @ E  ==  embedding row gather on the MXU.
    # precision=HIGHEST keeps the f32 table values exact (no single bf16 pass).
    idx = tok_ref[:, 0:1]                                                # (tile_n, 1)
    col_iota = lax.broadcasted_iota(jnp.int32, (tile_n, vp), 1)
    onehot = (idx == col_iota).astype(jnp.float32)                       # (tile_n, VP)
    logits = jnp.dot(onehot, emb_ref[...],
                     preferred_element_type=jnp.float32,
                     precision=lax.Precision.HIGHEST)                    # (tile_n, VP)

    if compute_logits:
        logits_ref[...] = logits                                         # lane-dense vst

    if compute_loss:
        tgt = tok_ref[:, 1:2]                                            # (tile_n, 1)
        # Pad columns already hold -1e30 (poisoned in the padded table), so the
        # log-sum-exp runs directly on `logits` — no vocab mask pass here.
        m = jnp.max(logits, axis=-1, keepdims=True)                      # (tile_n, 1)
        lse = m + jnp.log(jnp.sum(jnp.exp(logits - m), axis=-1, keepdims=True))

        # Per-element CE contribution: nonzero only at (row, tgt[row]).
        keep = tgt == col_iota
        if mask_rows:  # only when N was padded up to NP (tail rows exist)
            row_iota = lax.broadcasted_iota(jnp.int32, (tile_n, vp), 0)
            keep = keep & ((pl.program_id(0) * tile_n + row_iota) < n_true)
        contrib = jnp.where(keep, lse - logits, 0.0)                     # (tile_n, VP)

        # Per-block partial sum, written as one fully aligned (8, VP) block:
        # column sums land in sublane 0, sublanes 1..7 are zero.
        total = jnp.sum(contrib, axis=0, keepdims=True)                  # (1, VP)
        sub_iota = lax.broadcasted_iota(jnp.int32, (8, vp), 0)
        loss_ref[...] = jnp.where(sub_iota == 0, total, 0.0)


def bigram_forward(idx, emb_padded, targets=None, *, tile_n=1024,
                   return_logits=True):
    """Equivalent of BiGramLanguageModel.forward(idx, targets).

    Args:
      idx        : (B, T) int token ids.
      emb_padded : (VP, VP) float32 table from pad_embedding_table() — prepare
                   it once outside the jitted step.
      targets    : optional (B, T) int token ids.
      return_logits : set False for the loss-only training fast path (skips the
                   dominant logits HBM writeback entirely).

    Returns (logits, loss):
      logits : padded (NP, VP) float32 or None; true values are logits[:B*T, :V]
               (pad columns hold -1e30, pad rows are garbage) — consumers
               slice/mask lazily instead of the wrapper copying an (N, V) view.
      loss   : scalar float32 mean cross-entropy, or None if targets is None.
    """
    B, T = idx.shape
    N = B * T
    VP = emb_padded.shape[1]

    compute_loss = targets is not None
    compute_logits = return_logits or not compute_loss

    tile = _choose_tile_n(N, tile_n)
    num_blocks = pl.cdiv(N, tile)
    NP = num_blocks * tile

    # Pack idx (+ targets) into one (NP, w) int32 input -> single DMA per step.
    idx_flat = idx.reshape(N).astype(jnp.int32)
    if compute_loss:
        tok = jnp.stack([idx_flat, targets.reshape(N).astype(jnp.int32)], axis=1)
    else:
        tok = idx_flat[:, None]
    tok = jnp.pad(tok, ((0, NP - N), (0, 0)))
    w = tok.shape[1]

    out_shapes, out_specs = [], []
    if compute_logits:
        out_shapes.append(jax.ShapeDtypeStruct((NP, VP), jnp.float32))
        out_specs.append(pl.BlockSpec((tile, VP), lambda i: (i, 0)))
    if compute_loss:
        out_shapes.append(jax.ShapeDtypeStruct((num_blocks * 8, VP), jnp.float32))
        out_specs.append(pl.BlockSpec((8, VP), lambda i: (i, 0)))

    kernel = functools.partial(
        bigram_kernel, n_true=N, compute_logits=compute_logits,
        compute_loss=compute_loss, mask_rows=(NP != N))

    outs = pl.pallas_call(
        kernel,
        out_shape=tuple(out_shapes),
        grid_spec=pltpu.PrefetchScalarGridSpec(
            num_scalar_prefetch=0,
            grid=(num_blocks,),
            in_specs=[
                pl.BlockSpec((tile, w), lambda i: (i, 0)),    # packed idx/targets rows
                pl.BlockSpec((VP, VP), lambda i: (0, 0)),     # table, VMEM-resident
            ],
            out_specs=tuple(out_specs),
        ),
        compiler_params=pltpu.CompilerParams(
            dimension_semantics=("parallel",),                # shards across TCs on v7x
        ),
    )(tok, emb_padded)

    logits_p, loss = None, None
    k = 0
    if compute_logits:
        logits_p = outs[k]
        k += 1
    if compute_loss:
        loss = jnp.sum(outs[k]) * jnp.float32(1.0 / N)
    return logits_p, loss


# TODO(synk): generate() uses a torch.multinomial autoregressive sampling loop;
# only the forward pass / loss is implemented here.


if __name__ == "__main__":
    vocab_size = 65          # tiny-shakespeare-style char vocab
    B, T = 8, 40             # small shapes; N = 320 -> 2 row blocks of 256 (+ tail mask)
    N, V = B * T, vocab_size

    key = jax.random.PRNGKey(0)
    k_emb, k_idx, k_tgt = jax.random.split(key, 3)

    # nn.Embedding default init: N(0, 1)
    emb_table = jax.random.normal(k_emb, (vocab_size, vocab_size), dtype=jnp.float32)
    idx = jax.random.randint(k_idx, (B, T), 0, vocab_size, dtype=jnp.int32)
    targets = jax.random.randint(k_tgt, (B, T), 0, vocab_size, dtype=jnp.int32)

    # one-time table prep, outside the jitted step
    emb_p = pad_embedding_table(emb_table)

    # 1) PyTorch-equivalent call: logits + loss.
    fwd = jax.jit(bigram_forward)
    logits_p, loss = fwd(idx, emb_p, targets)
    jax.block_until_ready((logits_p, loss))

    # 2) loss-only fast path (training): no logits writeback at all.
    loss_fn = jax.jit(functools.partial(bigram_forward, return_logits=False))
    _, loss_only = loss_fn(idx, emb_p, targets)
    jax.block_until_ready(loss_only)

    # 3) logits-only path (targets=None, generation).
    logits_only, none_loss = jax.jit(bigram_forward)(idx, emb_p)
    jax.block_until_ready(logits_only)
    assert none_loss is None

    # Pure-numpy reference check (done outside the jitted step; slicing the
    # padded logits here is just for verification).
    idx_flat = np.asarray(idx).reshape(-1)
    tgt_flat = np.asarray(targets).reshape(-1)
    ref_logits = np.asarray(emb_table)[idx_flat]                       # (N, V) f32
    r64 = ref_logits.astype(np.float64)
    m = r64.max(axis=-1, keepdims=True)
    ref_lse = (m + np.log(np.exp(r64 - m).sum(axis=-1, keepdims=True)))[:, 0]
    ref_loss = float(np.mean(ref_lse - r64[np.arange(N), tgt_flat]))

    np.testing.assert_allclose(np.asarray(logits_p)[:N, :V], ref_logits,
                               rtol=1e-5, atol=1e-5)
    np.testing.assert_allclose(np.asarray(logits_only)[:N, :V], ref_logits,
                               rtol=1e-5, atol=1e-5)
    np.testing.assert_allclose(float(loss), ref_loss, rtol=1e-5, atol=1e-5)
    np.testing.assert_allclose(float(loss_only), ref_loss, rtol=1e-5, atol=1e-5)

    print("KERNEL_OK")
</pallas_src>

<mosaic_0001>
module attributes {stable_mosaic.version = 11 : i64} {
  func.func @bigram_kernel(%arg0: i32, %arg1: memref<256x2xi32, #tpu.memory_space<vmem>>, %arg2: memref<128x128xf32, #tpu.memory_space<vmem>>, %arg3: memref<256x128xf32, #tpu.memory_space<vmem>>, %arg4: memref<8x128xf32, #tpu.memory_space<vmem>>) attributes {dimension_semantics = [#tpu.dimension_semantics<parallel>], iteration_bounds = array<i64: 2>, scalar_prefetch = 0 : i64, scratch_operands = 0 : i64, tpu.core_type = #tpu.core_type<tc>, window_params = [{transform_indices = @transform_0, window_bounds = array<i64: 256, 2>}, {pipeline_mode = #tpu.pipeline_mode<synchronous>, transform_indices = @transform_1, window_bounds = array<i64: 128, 128>}, {transform_indices = @transform_2, window_bounds = array<i64: 256, 128>}, {transform_indices = @transform_3, window_bounds = array<i64: 8, 128>}]} {
    %c0 = arith.constant 0 : index
    %c0_0 = arith.constant 0 : index
    %0 = vector.load %arg1[%c0, %c0_0] : memref<256x2xi32, #tpu.memory_space<vmem>>, vector<256x1xi32>
    %1 = tpu.iota {dimensions = array<i32: 1>} : vector<256x128xi32>
    %2 = vector.broadcast %0 : vector<256x1xi32> to vector<256x128xi32>
    %3 = arith.cmpi eq, %2, %1 : vector<256x128xi32>
    %4 = arith.extui %3 : vector<256x128xi1> to vector<256x128xi32>
    %5 = arith.sitofp %4 : vector<256x128xi32> to vector<256x128xf32>
    %c0_1 = arith.constant 0 : index
    %c0_2 = arith.constant 0 : index
    %6 = vector.load %arg2[%c0_1, %c0_2] : memref<128x128xf32, #tpu.memory_space<vmem>>, vector<128x128xf32>
    %cst = arith.constant dense<0.000000e+00> : vector<256x128xf32>
    %7 = tpu.matmul %5, %6, %cst {dimension_numbers = #tpu.dot_dimension_numbers<[1], [0], [0], [1], [0, 0, 1, 1], [], []>, precision = #tpu.contract_precision<fp32>} : vector<256x128xf32>, vector<128x128xf32>, vector<256x128xf32> -> vector<256x128xf32>
    %c0_3 = arith.constant 0 : index
    %c0_4 = arith.constant 0 : index
    %8 = vector.load %arg3[%c0_3, %c0_4] : memref<256x128xf32, #tpu.memory_space<vmem>>, vector<256x128xf32>
    tpu.vector_store %arg3[%c0_3, %c0_4], %7 {strides = array<i32>} : memref<256x128xf32, #tpu.memory_space<vmem>>, vector<256x128xf32>,
    %c0_5 = arith.constant 0 : index
    %c1 = arith.constant 1 : index
    %9 = vector.load %arg1[%c0_5, %c1] : memref<256x2xi32, #tpu.memory_space<vmem>>, vector<256x1xi32>
    %cst_6 = arith.constant dense<0xFF800000> : vector<256xf32>
    %10 = vector.multi_reduction <maximumf>, %7, %cst_6 [1] : vector<256x128xf32> to vector<256xf32>
    %11 = vector.shape_cast %10 : vector<256xf32> to vector<256x1xf32>
    %12 = vector.broadcast %11 : vector<256x1xf32> to vector<256x128xf32>
    %13 = arith.subf %7, %12 : vector<256x128xf32>
    %14 = math.exp %13 : vector<256x128xf32>
    %cst_7 = arith.constant dense<0.000000e+00> : vector<256xf32>
    %15 = vector.multi_reduction <add>, %14, %cst_7 [1] : vector<256x128xf32> to vector<256xf32>
    %16 = vector.shape_cast %15 : vector<256xf32> to vector<256x1xf32>
    %17 = math.log %16 : vector<256x1xf32>
    %18 = arith.addf %11, %17 : vector<256x1xf32>
    %19 = vector.broadcast %9 : vector<256x1xi32> to vector<256x128xi32>
    %20 = arith.cmpi eq, %19, %1 : vector<256x128xi32>
    %21 = tpu.iota {dimensions = array<i32: 0>} : vector<256x128xi32>
    %c256_i32 = arith.constant 256 : i32
    %22 = arith.muli %arg0, %c256_i32 : i32
    %23 = vector.broadcast %22 : i32 to vector<256x128xi32>
    %24 = arith.addi %23, %21 : vector<256x128xi32>
    %c320_i32 = arith.constant 320 : i32
    %25 = vector.broadcast %c320_i32 : i32 to vector<256x128xi32>
    %26 = arith.cmpi slt, %24, %25 : vector<256x128xi32>
    %27 = arith.andi %20, %26 : vector<256x128xi1>
    %28 = vector.broadcast %18 : vector<256x1xf32> to vector<256x128xf32>
    %29 = arith.subf %28, %7 : vector<256x128xf32>
    %cst_8 = arith.constant 0.000000e+00 : f32
    %30 = vector.broadcast %cst_8 : f32 to vector<256x128xf32>
    %31 = arith.select %27, %29, %30 : vector<256x128xi1>, vector<256x128xf32>
    %cst_9 = arith.constant dense<0.000000e+00> : vector<128xf32>
    %32 = vector.multi_reduction <add>, %31, %cst_9 [0] : vector<256x128xf32> to vector<128xf32>
    %33 = vector.shape_cast %32 : vector<128xf32> to vector<1x128xf32>
    %34 = tpu.iota {dimensions = array<i32: 0>} : vector<8x128xi32>
    %c0_i32 = arith.constant 0 : i32
    %35 = vector.broadcast %c0_i32 : i32 to vector<8x128xi32>
    %36 = arith.cmpi eq, %34, %35 : vector<8x128xi32>
    %cst_10 = arith.constant 0.000000e+00 : f32
    %37 = vector.shape_cast %33 : vector<1x128xf32> to vector<1x128xf32>
    %38 = vector.broadcast %37 : vector<1x128xf32> to vector<8x128xf32>
    %39 = vector.broadcast %cst_10 : f32 to vector<8x128xf32>
    %40 = arith.select %36, %38, %39 : vector<8x128xi1>, vector<8x128xf32>
    %c0_11 = arith.constant 0 : index
    %c0_12 = arith.constant 0 : index
    %41 = vector.load %arg4[%c0_11, %c0_12] : memref<8x128xf32, #tpu.memory_space<vmem>>, vector<8x128xf32>
    tpu.vector_store %arg4[%c0_11, %c0_12], %40 {strides = array<i32>} : memref<8x128xf32, #tpu.memory_space<vmem>>, vector<8x128xf32>,
    return
  }
  func.func @transform_0(%arg0: i32) -> (i32, i32) {
    %c0_i32 = arith.constant 0 : i32
    %c0_i32_0 = arith.constant 0 : i32
    return %arg0, %c0_i32 : i32, i32
  }
  func.func @transform_1(%arg0: i32) -> (i32, i32) {
    %c0_i32 = arith.constant 0 : i32
    %c0_i32_0 = arith.constant 0 : i32
    %c0_i32_1 = arith.constant 0 : i32
    return %c0_i32, %c0_i32_0 : i32, i32
  }
  func.func @transform_2(%arg0: i32) -> (i32, i32) {
    %c0_i32 = arith.constant 0 : i32
    %c0_i32_0 = arith.constant 0 : i32
    return %arg0, %c0_i32 : i32, i32
  }
  func.func @transform_3(%arg0: i32) -> (i32, i32) {
    %c0_i32 = arith.constant 0 : i32
    %c0_i32_0 = arith.constant 0 : i32
    return %arg0, %c0_i32 : i32, i32
  }
}

</mosaic_0001>

<bundles_post_ra>
// kernel: bigram_forward.1
= control target key start
LH: loop header
LB: loop body
LE: loop exit
PB: predicated region body
PF: predicated region fallthrough
CT: control target
= control target key end

     0   :  { %9 = vsyncpa [#allocation3], 0  ;;  %s6876_s0 = inlined_call_operand.vmem [shape: s32[512,2], index: 0, kind: input, shape index: {}]   ;;  %s6877_s1 = inlined_call_operand.vmem [shape: f32[128,128], index: 1, kind: input, shape index: {}]   ;;  %s6878_s2 = inlined_call_operand.hbm [shape: f32[512,128], index: 2, kind: output, shape index: {0}]   ;;  %s6879_s3 = inlined_call_operand.vmem [shape: f32[16,128], index: 3, kind: output, shape index: {1}]  }
   0x1   :  { %11 = vsyncpa [#allocation3 + $0x1], 0  ;;  %s4784_s12 = smov 0   ;;  %s4786_s13 = smov 0  }
   0x2   :  { %s4788_s14 = smov 0   ;;  %s4790_s15 = smov 0  }
   0x3 LB: > { %s4805_s16 = sadd.s32 4294967295, %s4755_s15   ;;  %s3253_s17 = sadd.s32 4294967294, %s4755_s15   ;;  %s4755_s15 = sphi %s4790_s15, %s7217_s15   ;;  %s4751_s14 = sphi %s4788_s14, %s7216_s14   ;;  %s4747_s13 = sphi %s4786_s13, %s7215_s13   ;;  %s4743_s12 = sphi %s4784_s12, %s7214_s12  }
   0x4   : > { %s4809_s18 = sadd.s32 1, %s4755_s15   ;;  %s71_s19 = sadd.s32 1, %s4751_s14 }
   0x5   : > { %s68_s20 = ssub.s32 %s4755_s15, %s4809_s18  ;;  %p81_p0 = scmp.ne.s32.totalorder %s4751_s14, %s4747_s13 }
   0x6   : > { %p69_p1 = scmp.eq.s32.totalorder %s68_s20, 0  ;;  %p82_p2 = scmp.eq.s32.totalorder %s4805_s16, 1 }
   0x7   : > { %p87_p3 = scmp.ne.s32.totalorder %s4747_s13, %s4743_s12  ;;  %p88_p4 = scmp.eq.s32.totalorder %s3253_s17, 1 }
   0x8   : > { %s4820_s21 = scalar_select %p69_p1, %s4751_s14, %s71_s19  }
   0x9   : > { %p4822_p5 = por %p82_p2, %p81_p0  ;;  %p4826_p6 = por %p88_p4, %p87_p3 }
   0xa   : > { %p3256_p7 = scmp.ge.s32.totalorder %s4755_s15, 1  ;;  %p144_p8 = scmp.lt.s32.totalorder %s4755_s15, 3 }
   0xc   : > { %p145_p9 = pnand %p3256_p7, %p144_p8 }
   0xe   : > { %148 = sbr.rel (%p145_p9) target bundleno = 916 (0x394), region = 28 }
  0x15   : > { %s3258_s24 = sshll.u32 %s4805_s16, 5  ;;  %v4836_v0 = vld [vmem:[%s6877_s1] sm:$0xff]  ;;  %v4841_v1 = vld [vmem:[%s6877_s1 + $0x8] sm:$0xff]  ;;  %v4846_v2 = vld [vmem:[%s6877_s1 + $0x10] sm:$0xff]  ;;  %v4757_v3 = vmov 0   ;;  %s163_s26 = sand.u32 1, %s4747_s13  }
  0x16   : > { %4562 = vset.pattern.permute.xlu1 %v4757_v3  ;;  %4561 = vset.pattern.permute.xlu0 %v4757_v3  ;;  %p173_p10 = scmp.lt.s32.totalorder %s3258_s24, 63  ;;  %v426_v4 = vand.u32 4294901760, %v4836_v0  ;;  %v429_v5 = vand.u32 4294901760, %v4841_v1  ;;  %v4853_v6 = vld [vmem:[%s6877_s1 + $0x18] sm:$0xff]  ;;  %v432_v7 = vand.u32 4294901760, %v4846_v2  ;;  %v4859_v8 = vld [vmem:[%s6877_s1 + $0x20] sm:$0xff] }
  0x17   : > { %v435_v9 = vand.u32 4294901760, %v4853_v6  ;;  %v4865_v10 = vld [vmem:[%s6877_s1 + $0x28] sm:$0xff]  ;;  %v438_v12 = vand.u32 4294901760, %v4859_v8  ;;  %v4884_v15 = vld [vmem:[%s6877_s1 + $0x30] sm:$0xff]  ;;  %v4889_v16 = vld [vmem:[%s6877_s1 + $0x38] sm:$0xff]  ;;  %s3395_s29 = sshll.u32 %s4805_s16, 12 }
  0x18   : > { %s7219_s24 = smov (!%p173_p10, %s3258_s24), 63  ;;  %v4871_v11 = vpack.c.bf16 %v429_v5, %v426_v4  ;;  %v441_v13 = vand.u32 4294901760, %v4865_v10  ;;  %v444_v20 = vand.u32 4294901760, %v4884_v15  ;;  %v447_v21 = vand.u32 4294901760, %v4889_v16  ;;  %v4915_v22 = vld [vmem:[%s6877_s1 + $0x40] sm:$0xff]  ;;  %v4920_v23 = vld [vmem:[%s6877_s1 + $0x48] sm:$0xff]  ;;  %s6435_s6 = scalar_lea.hbm %s6878_s2, %s3395_s29 }
  0x19   : > { %v4879_v14 = vpack.c.bf16 %v435_v9, %v432_v7  ;;  %s3259_s20 = sshll.u32 %s7219_s24, 3  ;;  %v450_v27 = vand.u32 4294901760, %v4915_v22  ;;  %v453_v28 = vand.u32 4294901760, %v4920_v23  ;;  %v4939_v29 = vld [vmem:[%s6877_s1 + $0x50] sm:$0xff]  ;;  %v4944_v30 = vld [vmem:[%s6877_s1 + $0x58] sm:$0xff]  ;;  %v4963_v36 = vld [vmem:[%s6877_s1 + $0x60] sm:$0xff]  ;;  %v5001_v47 = vsub.f32 %v4836_v0, %v426_v4 }
  0x1a   : > { %4261 = vmatprep.subr.bf16.mxu0 %v4871_v11  ;;  %4165 = vmatprep.subr.bf16.mxu1 %v4871_v11  ;;  %s4896_s27 = scalar_lea.vmem %s6876_s0, %s3259_s20  ;;  %v4908_v19 = vpack.c.bf16 %v441_v13, %v438_v12  ;;  %v4932_v26 = vpack.c.bf16 %v447_v21, %v444_v20  ;;  %v456_v34 = vand.u32 4294901760, %v4939_v29  ;;  %v459_v35 = vand.u32 4294901760, %v4944_v30  ;;  %v4968_v37 = vld [vmem:[%s6877_s1 + $0x68] sm:$0xff]  ;;  %v4987_v43 = vld [vmem:[%s6877_s1 + $0x70] sm:$0xff]  ;;  %v4992_v44 = vld [vmem:[%s6877_s1 + $0x78] sm:$0xff]  ;;  %s3257_s24 = sshll.u32 %s163_s26, 8 }
  0x1b   : > { %4263 = vmatpush3.bf16.msra.mxu0 %v4871_v11  ;;  %4167 = vmatpush3.bf16.msra.mxu1 %v4871_v11  ;;  %v185_v17 = vld [vmem:[%s4896_s27 + $0x10] sm:$0xff]  ;;  %v183_v18 = vld [vmem:[%s4896_s27] sm:$0xff]  ;;  %v186_v24 = vld [vmem:[%s4896_s27 + $0x18] sm:$0xff]  ;;  %v4956_v33 = vpack.c.bf16 %v453_v28, %v450_v27  ;;  %v462_v41 = vand.u32 4294901760, %v4963_v36  ;;  %v465_v42 = vand.u32 4294901760, %v4968_v37  ;;  %v5006_v48 = vsub.f32 %v4841_v1, %v429_v5  ;;  %s6084_s28 = scalar_lea.vmem [#allocation2], %s3257_s24 }
  0x1c   : > { %4265 = vmatprep.subr.bf16.mxu0 %v4879_v14  ;;  %4169 = vmatprep.subr.bf16.mxu1 %v4879_v14  ;;  %v184_v25 = vld [vmem:[%s4896_s27 + $0x8] sm:$0xff]  ;;  %v187_v32 = vld [vmem:[%s4896_s27 + $0x20] sm:$0xff]  ;;  %v190_v38 = vld [vmem:[%s4896_s27 + $0x38] sm:$0xff]  ;;  %v4980_v40 = vpack.c.bf16 %v459_v35, %v456_v34  ;;  %v468_v50 = vand.u32 4294901760, %v4987_v43  ;;  %v471_v51 = vand.u32 4294901760, %v4992_v44  ;;  %v829_v52 = vand.u32 4294901760, %v5001_v47 }
  0x1d   : > { %224 = vperm.xlu1 %4562, %v185_v17   ;;  %218 = vperm.xlu0 %4561, %v183_v18   ;;  %v188_v31 = vld [vmem:[%s4896_s27 + $0x28] sm:$0xff]  ;;  %v189_v39 = vld [vmem:[%s4896_s27 + $0x30] sm:$0xff]  ;;  %v191_v46 = vld [vmem:[%s4896_s27 + $0x40] sm:$0xff]  ;;  %v5014_v49 = vpack.c.bf16 %v465_v42, %v462_v41  ;;  %v836_v53 = vand.u32 4294901760, %v5006_v48  ;;  %v5041_v63 = vsub.f32 %v4846_v2, %v432_v7  ;;  %v5046_v0 = vsub.f32 %v4853_v6, %v435_v9  ;;  %s3164_s30 = sshll.u32 %s6084_s28, 4  ;;  %s6441_s7 = scalar_lea.sflag [#allocation3], %s163_s26  ;;  %s6437_s30 = int_to_ptr.vmem [resolvable:$true] %s3164_s30 }
  0x1e   : > { %v192_v45 = vld [vmem:[%s4896_s27 + $0x48] sm:$0xff]  ;;  %v194_v54 = vld [vmem:[%s4896_s27 + $0x58] sm:$0xff]  ;;  %v193_v55 = vld [vmem:[%s4896_s27 + $0x50] sm:$0xff]  ;;  %v830_v56 = vsub.f32 %v5001_v47, %v829_v52  ;;  %v5032_v58 = vpack.c.bf16 %v471_v51, %v468_v50  ;;  %s4693_s8 = scalar_lea.vmem %s6437_s30, 4096 }
  0x1f   : > { %4267 = vmatpush3.bf16.msra.mxu0 %v4879_v14  ;;  %4171 = vmatpush3.bf16.msra.mxu1 %v4879_v14  ;;  %v837_v57 = vsub.f32 %v5006_v48, %v836_v53  ;;  %v196_v61 = vld [vmem:[%s4896_s27 + $0x68] sm:$0xff]  ;;  %v195_v62 = vld [vmem:[%s4896_s27 + $0x60] sm:$0xff]  ;;  %v5052_v3 = vpack.c.bf16 %v836_v53, %v829_v52  ;;  %v843_v4 = vand.u32 4294901760, %v5041_v63  ;;  %v850_v2 = vand.u32 4294901760, %v5046_v0  ;;  %v198_v5 = vld [vmem:[%s4896_s27 + $0x78] sm:$0xff]  ;;  %p4694_p11 = scmp.ne.s32.totalorder %s6437_s30, %s4693_s8 }
  0x20   : > { %4269 = vmatprep.subr.bf16.mxu0 %v4908_v19  ;;  %4173 = vmatprep.subr.bf16.mxu1 %v4908_v19  ;;  %v831_v59 = vand.u32 4294901760, %v830_v56  ;;  %v197_v7 = vld [vmem:[%s4896_s27 + $0x70] sm:$0xff]  ;;  %v202_v52 = vld [vmem:[%s4896_s27 + $0x98] sm:$0xff]  ;;  %v203_v56 = vld [vmem:[%s4896_s27 + $0xa0] sm:$0xff] }
  0x21   : > { %227 = vperm.xlu1 %4562, %v186_v24   ;;  %221 = vperm.xlu0 %4561, %v184_v25   ;;  %v838_v60 = vand.u32 4294901760, %v837_v57  ;;  %v844_v6 = vsub.f32 %v5041_v63, %v843_v4  ;;  %v851_v9 = vsub.f32 %v5046_v0, %v850_v2  ;;  %v5062_v17 = vpack.c.bf16 %v850_v2, %v843_v4  ;;  %v200_v25 = vld [vmem:[%s4896_s27 + $0x88] sm:$0xff]  ;;  %v201_v53 = vld [vmem:[%s4896_s27 + $0x90] sm:$0xff]  ;;  %v206_v4 = vld [vmem:[%s4896_s27 + $0xb8] sm:$0xff]  ;;  %p4695_p12 = pnand %p4694_p11, %p4822_p5 }
  0x22   : > { %v205_v2 = vld [vmem:[%s4896_s27 + $0xb0] sm:$0xff] }
  0x23   : > { %4271 = vmatpush3.bf16.msra.mxu0 %v4908_v19  ;;  %4175 = vmatpush3.bf16.msra.mxu1 %v4908_v19  ;;  %v5050_v1 = vpack.c.bf16 %v838_v60, %v831_v59  ;;  %v845_v18 = vand.u32 4294901760, %v844_v6  ;;  %v852_v24 = vand.u32 4294901760, %v851_v9  ;;  %v5095_v59 = vsub.f32 %v4884_v15, %v444_v20  ;;  %v207_v6 = vld [vmem:[%s4896_s27 + $0xc0] sm:$0xff]  ;;  %p4696_p13 = pneg %p4695_p12 }
  0x24   : > { %4273 = vmatprep.subr.bf16.mxu0 %v4932_v26  ;;  %4177 = vmatprep.subr.bf16.mxu1 %v4932_v26  ;;  %v5100_v60 = vsub.f32 %v4889_v16, %v447_v21 }
  0x25   : > { %233 = vperm.xlu1 %4562, %v188_v31   ;;  %230 = vperm.xlu0 %4561, %v187_v32   ;;  %v199_v31 = vld [vmem:[%s4896_s27 + $0x80] sm:$0xff]  ;;  %v5068_v32 = vpack.c.bf16 %v852_v24, %v845_v18  ;;  %v884_v18 = vsub.f32 %v4915_v22, %v450_v27  ;;  %v891_v24 = vsub.f32 %v4920_v23, %v453_v28 }
  0x26   : > { %v898_v23 = vsub.f32 %v4939_v29, %v456_v34  ;;  %v905_v28 = vsub.f32 %v4944_v30, %v459_v35  ;;  %v912_v29 = vsub.f32 %v4963_v36, %v462_v41  ;;  %v919_v30 = vsub.f32 %v4968_v37, %v465_v42 }
  0x27   : > { %4275 = vmatpush3.bf16.msra.mxu0 %v4932_v26  ;;  %4179 = vmatpush3.bf16.msra.mxu1 %v4932_v26  ;;  %v933_v36 = vsub.f32 %v4992_v44, %v471_v51  ;;  %v5166_v44 = vpack.c.bf16 %v5046_v0, %v5041_v63  ;;  %v5174_v51 = vpack.c.bf16 %v5100_v60, %v5095_v59  ;;  %v6881_v0 = vmov 0.0  }
  0x28   : > { %4277 = vmatprep.subr.bf16.mxu0 %v4956_v33  ;;  %4181 = vmatprep.subr.bf16.mxu1 %v4956_v33  ;;  %v913_v35 = vand.u32 4294901760, %v912_v29 }
  0x29   : > { %239 = vperm.xlu1 %4562, %v190_v38   ;;  %236 = vperm.xlu0 %4561, %v189_v39   ;;  %v5073_v38 = vsub.f32 %v4859_v8, %v438_v12  ;;  %v5078_v39 = vsub.f32 %v4865_v10, %v441_v13  ;;  %v934_v37 = vand.u32 4294901760, %v933_v36 }
  0x2b   : > { %4279 = vmatpush3.bf16.msra.mxu0 %v4956_v33  ;;  %4183 = vmatpush3.bf16.msra.mxu1 %v4956_v33 }
  0x2c   : > { %4281 = vmatprep.subr.bf16.mxu0 %v4980_v40  ;;  %4185 = vmatprep.subr.bf16.mxu1 %v4980_v40 }
  0x2d   : > { %245 = vperm.xlu1 %4562, %v192_v45   ;;  %242 = vperm.xlu0 %4561, %v191_v46   ;;  %v857_v45 = vand.u32 4294901760, %v5073_v38  ;;  %v864_v46 = vand.u32 4294901760, %v5078_v39 }
  0x2f   : > { %4283 = vmatpush3.bf16.msra.mxu0 %v4980_v40  ;;  %4187 = vmatpush3.bf16.msra.mxu1 %v4980_v40  ;;  %v865_v8 = vsub.f32 %v5078_v39, %v864_v46  ;;  %v5086_v12 = vpack.c.bf16 %v864_v46, %v857_v45  ;;  %v209_v46 = vld [vmem:[%s4896_s27 + $0xd0] sm:$0xff] }
  0x30   : > { %4285 = vmatprep.subr.bf16.mxu0 %v5014_v49  ;;  %4189 = vmatprep.subr.bf16.mxu1 %v5014_v49 }
  0x31   : > { %251 = vperm.xlu1 %4562, %v194_v54   ;;  %248 = vperm.xlu0 %4561, %v193_v55   ;;  %v858_v54 = vsub.f32 %v5073_v38, %v857_v45  ;;  %v866_v13 = vand.u32 4294901760, %v865_v8  ;;  %v204_v55 = vld [vmem:[%s4896_s27 + $0xa8] sm:$0xff]  ;;  %v210_v45 = vld [vmem:[%s4896_s27 + $0xd8] sm:$0xff] }
  0x32   : > { %v212_v8 = vld [vmem:[%s4896_s27 + $0xe8] sm:$0xff] }
  0x33   : > { %4287 = vmatpush3.bf16.msra.mxu0 %v5014_v49  ;;  %4191 = vmatpush3.bf16.msra.mxu1 %v5014_v49  ;;  %v859_v10 = vand.u32 4294901760, %v858_v54 }
  0x34   : > { %4289 = vmatprep.subr.bf16.mxu0 %v5032_v58  ;;  %4193 = vmatprep.subr.bf16.mxu1 %v5032_v58 }
  0x35   : > { %257 = vperm.xlu1 %4562, %v196_v61   ;;  %254 = vperm.xlu0 %4561, %v195_v62   ;;  %v5090_v57 = vpack.c.bf16 %v866_v13, %v859_v10  ;;  %v871_v61 = vand.u32 4294901760, %v5095_v59  ;;  %v878_v62 = vand.u32 4294901760, %v5100_v60  ;;  %v211_v10 = vld [vmem:[%s4896_s27 + $0xe0] sm:$0xff] }
  0x37   : > { %4291 = vmatpush3.bf16.msra.mxu0 %v5032_v58  ;;  %4195 = vmatpush3.bf16.msra.mxu1 %v5032_v58  ;;  %v879_v15 = vsub.f32 %v5100_v60, %v878_v62  ;;  %v5108_v20 = vpack.c.bf16 %v878_v62, %v871_v61  ;;  %v213_v62 = vld [vmem:[%s4896_s27 + $0xf0] sm:$0xff] }
  0x38   : > { %4197 = vmatprep.subr.bf16.mxu1 %v5050_v1  ;;  %4293 = vmatprep.subr.bf16.mxu0 %v5052_v3 }
  0x39   : > { %263 = vperm.xlu1 %4562, %v198_v5   ;;  %260 = vperm.xlu0 %4561, %v197_v7   ;;  %v872_v5 = vsub.f32 %v5095_v59, %v871_v61  ;;  %v880_v21 = vand.u32 4294901760, %v879_v15  ;;  %v208_v7 = vld [vmem:[%s4896_s27 + $0xc8] sm:$0xff]  ;;  %v214_v61 = vld [vmem:[%s4896_s27 + $0xf8] sm:$0xff] }
  0x3b   : > { %v873_v16 = vand.u32 4294901760, %v872_v5 }
  0x3d   : > { %269 = vperm.xlu1 %4562, %v200_v25   ;;  %266 = vperm.xlu0 %4561, %v199_v31   ;;  %v5112_v9 = vpack.c.bf16 %v880_v21, %v873_v16  ;;  %v885_v25 = vand.u32 4294901760, %v884_v18  ;;  %v892_v31 = vand.u32 4294901760, %v891_v24  ;;  %v920_v21 = vand.u32 4294901760, %v919_v30 }
  0x3f   : > { %v5122_v54 = vpack.c.bf16 %v892_v31, %v885_v25 }
  0x41   : > { %275 = vperm.xlu1 %4562, %v202_v52   ;;  %272 = vperm.xlu0 %4561, %v201_v53   ;;  %v886_v52 = vsub.f32 %v884_v18, %v885_v25  ;;  %v893_v53 = vsub.f32 %v891_v24, %v892_v31  ;;  %v5146_v25 = vpack.c.bf16 %v920_v21, %v913_v35 }
  0x42   : > { %v926_v31 = vsub.f32 %v4987_v43, %v468_v50  ;;  %v5162_v43 = vpack.c.bf16 %v5006_v48, %v5001_v47  ;;  %v5170_v50 = vpack.c.bf16 %v5078_v39, %v5073_v38 }
  0x43   : > { %v887_v22 = vand.u32 4294901760, %v886_v52  ;;  %v894_v27 = vand.u32 4294901760, %v893_v53  ;;  %v935_v53 = vsub.f32 %v933_v36, %v934_v37 }
  0x45   : > { %281 = vperm.xlu1 %4562, %v204_v55   ;;  %278 = vperm.xlu0 %4561, %v203_v56   ;;  %v5126_v13 = vpack.c.bf16 %v894_v27, %v887_v22  ;;  %v899_v55 = vand.u32 4294901760, %v898_v23  ;;  %v906_v56 = vand.u32 4294901760, %v905_v28 }
  0x47   : > { %v5136_v5 = vpack.c.bf16 %v906_v56, %v899_v55 }
  0x49   : > { %287 = vperm.xlu1 %4562, %v206_v4   ;;  %284 = vperm.xlu0 %4561, %v205_v2   ;;  %v900_v4 = vsub.f32 %v898_v23, %v899_v55  ;;  %v907_v2 = vsub.f32 %v905_v28, %v906_v56  ;;  %v5176_v55 = vpack.c.bf16 %v891_v24, %v884_v18 }
  0x4a   : > { %v5178_v56 = vpack.c.bf16 %v905_v28, %v898_v23  ;;  %v5209_v23 = vpack.c.bf16 %v933_v36, %v926_v31 }
  0x4b   : > { %v901_v15 = vand.u32 4294901760, %v900_v4  ;;  %v908_v16 = vand.u32 4294901760, %v907_v2 }
  0x4d   : > { %293 = vperm.xlu1 %4562, %v208_v7   ;;  %290 = vperm.xlu0 %4561, %v207_v6   ;;  %v5144_v34 = vpack.c.bf16 %v908_v16, %v901_v15  ;;  %v914_v7 = vsub.f32 %v912_v29, %v913_v35  ;;  %v921_v6 = vsub.f32 %v919_v30, %v920_v21 }
  0x4f   : > { %v915_v41 = vand.u32 4294901760, %v914_v7 }
  0x51   : > { %299 = vperm.xlu1 %4562, %v210_v45   ;;  %296 = vperm.xlu0 %4561, %v209_v46   ;;  %v922_v45 = vand.u32 4294901760, %v921_v6  ;;  %v927_v46 = vand.u32 4294901760, %v926_v31 }
  0x53   : > { %v5154_v42 = vpack.c.bf16 %v922_v45, %v915_v41  ;;  %v928_v52 = vsub.f32 %v926_v31, %v927_v46  ;;  %v5156_v22 = vpack.c.bf16 %v934_v37, %v927_v46 }
  0x55   : > { %305 = vperm.xlu1 %4562, %v212_v8   ;;  %302 = vperm.xlu0 %4561, %v211_v10   ;;  %v929_v27 = vand.u32 4294901760, %v928_v52  ;;  %v936_v8 = vand.u32 4294901760, %v935_v53 }
  0x57   : > { %v5158_v10 = vpack.c.bf16 %v936_v8, %v929_v27 }
  0x59   : > { %311 = vperm.xlu1 %4562, %v214_v61   ;;  %308 = vperm.xlu0 %4561, %v213_v62   ;;  %v6880_v61 = vlaneseq  ;;  %v5180_v62 = vpack.c.bf16 %v919_v30, %v912_v29 }
  0x5b   : > { %v5183_v47 = vand.u32 127, %v6880_v61 }
  0x9c   : > { %v5185_v48 = vpop.permute.xlu1 %224  ;;  %v5187_v63 = vpop.permute.xlu0 %218 }
  0x9d   : > { %vm315_vm0 = vcmp.eq.s32.totalorder %v5185_v48, %v5183_v47  ;;  %vm313_vm1 = vcmp.eq.s32.totalorder %v5187_v63, %v5183_v47  ;;  %v2452_v63 = vld [vmem:[%s4896_s27 + $0xa8] sm:$0xff]  ;;  %v2454_v48 = vld [vmem:[%s4896_s27 + $0xb8] sm:$0xff] }
  0x9e   : > { %v3263_v38 = vsel %vm315_vm0, 1.0, %v6881_v0  ;;  %v3261_v39 = vsel %vm313_vm1, 1.0, %v6881_v0 }
  0x9f   : > { %v5201_v59 = vsub.f32 %v3263_v38, %v3263_v38  ;;  %v5203_v60 = vsub.f32 %v3261_v39, %v3261_v39 }
  0xa0   : > { %v5205_v18 = vpop.permute.xlu1 %227  ;;  %v5207_v24 = vpop.permute.xlu0 %221 }
  0xa1   : > { %6993 = vst [vmem:[#allocation5_spill] sm:$0xff] %v5201_v59  ;;  %6994 = vst [vmem:[#allocation6_spill] sm:$0xff] %v5203_v60  ;;  %vm316_vm2 = vcmp.eq.s32.totalorder %v5205_v18, %v5183_v47  ;;  %vm314_vm3 = vcmp.eq.s32.totalorder %v5207_v24, %v5183_v47  ;;  %v508_v28 = vand.u32 4294901760, %v5203_v60  ;;  %v528_v15 = vand.u32 4294901760, %v5201_v59  ;;  %v2457_v24 = vld [vmem:[%s4896_s27 + $0xd0] sm:$0xff] }
  0xa2   : > { %v3264_v4 = vsel %vm316_vm2, 1.0, %v6881_v0  ;;  %v3262_v2 = vsel %vm314_vm3, 1.0, %v6881_v0 }
  0xa3   : > { %v5225_v16 = vsub.f32 %v3264_v4, %v3264_v4  ;;  %v5227_v29 = vsub.f32 %v3262_v2, %v3262_v2  ;;  %3956 = vmatprep.mubr.f32.mxu0 %v508_v28  ;;  %v509_v30 = vsub.f32 %v5203_v60, %v508_v28  ;;  %v529_v45 = vsub.f32 %v5201_v59, %v528_v15 }
  0xa4   : > { %v5230_v35 = vpop.permute.xlu1 %233  ;;  %v5232_v21 = vpop.permute.xlu0 %230 }
  0xa5   : > { %6995 = vst [vmem:[#allocation7_spill] sm:$0xff] %v5225_v16  ;;  %6996 = vst [vmem:[#allocation8_spill] sm:$0xff] %v5227_v29  ;;  %vm318_vm4 = vcmp.eq.s32.totalorder %v5230_v35, %v5183_v47  ;;  %vm317_vm5 = vcmp.eq.s32.totalorder %v5232_v21, %v5183_v47  ;;  %v510_v7 = vand.u32 4294901760, %v509_v30  ;;  %v518_v6 = vand.u32 4294901760, %v5227_v29  ;;  %v2456_v21 = vld [vmem:[%s4896_s27 + $0xc8] sm:$0xff]  ;;  %v2458_v35 = vld [vmem:[%s4896_s27 + $0xd8] sm:$0xff] }
  0xa6   : > { %v3266_v31 = vsel %vm318_vm4, 1.0, %v6881_v0  ;;  %v3265_v36 = vsel %vm317_vm5, 1.0, %v6881_v0  ;;  %v538_v41 = vand.u32 4294901760, %v5225_v16  ;;  %v530_v4 = vand.u32 4294901760, %v529_v45 }
  0xa7   : > { %v5249_v46 = vsub.f32 %v3266_v31, %v3266_v31  ;;  %v5251_v37 = vsub.f32 %v3265_v36, %v3265_v36  ;;  %3716 = vmatprep.mubr.f32.mxu1 %v510_v7  ;;  %3957 = vmatmul.mubr.f32.vlgmr.msra.gmra.mrb[0].mxu0 %v518_v6  ;;  %v519_v52 = vsub.f32 %v5227_v29, %v518_v6 }
  0xa8   : > { %v5254_v53 = vpop.permute.xlu1 %239  ;;  %3959 = vmatprep.mubr.f32.mxu0 %v528_v15  ;;  %v5256_v27 = vpop.permute.xlu0 %236  ;;  %4295 = vmatpush3.bf16.msra.mxu0 %v5052_v3  ;;  %v539_v8 = vsub.f32 %v5225_v16, %v538_v41 }
  0xa9   : > { %6997 = vst [vmem:[#allocation9_spill] sm:$0xff] %v5249_v46  ;;  %6998 = vst [vmem:[#allocation10_spill] sm:$0xff] %v5251_v37  ;;  %vm320_vm6 = vcmp.eq.s32.totalorder %v5254_v53, %v5183_v47  ;;  %vm319_vm7 = vcmp.eq.s32.totalorder %v5256_v27, %v5183_v47  ;;  %v520_v38 = vand.u32 4294901760, %v519_v52  ;;  %v548_v39 = vand.u32 4294901760, %v5251_v37  ;;  %4297 = vmatprep.subr.bf16.mxu0 %v5062_v17 }
  0xaa   : > { %v3268_v28 = vsel %vm320_vm6, 1.0, %v6881_v0  ;;  %v3267_v3 = vsel %vm319_vm7, 1.0, %v6881_v0  ;;  %v558_v2 = vand.u32 4294901760, %v5249_v46  ;;  %v540_v36 = vand.u32 4294901760, %v539_v8 }
  0xab   : > { %v5275_v15 = vsub.f32 %v3268_v28, %v3268_v28  ;;  %v5277_v30 = vsub.f32 %v3267_v3, %v3267_v3  ;;  %3717 = vmatmul.mubr.f32.vlgmr.msra.gmra.mrb[0].mxu1 %v520_v38  ;;  %3960 = vmatmul.mubr.f32.gmra.mrb[2].mxu0 %v538_v41  ;;  %v549_v7 = vsub.f32 %v5251_v37, %v548_v39 }
  0xac   : > { %4199 = vmatpush3.bf16.msra.mxu1 %v5050_v1  ;;  %v5281_v6 = vpop.permute.xlu1 %245  ;;  %3719 = vmatprep.mubr.f32.mxu1 %v530_v4  ;;  %v5283_v31 = vpop.permute.xlu0 %242  ;;  %v559_v45 = vsub.f32 %v5249_v46, %v558_v2 }
  0xad   : > { %6999 = vst [vmem:[#allocation11_spill] sm:$0xff] %v5275_v15  ;;  %7000 = vst [vmem:[#allocation12_spill] sm:$0xff] %v5277_v30  ;;  %vm322_vm8 = vcmp.eq.s32.totalorder %v5281_v6, %v5183_v47  ;;  %3962 = vmatprep.mubr.f32.mxu0 %v548_v39  ;;  %vm321_vm9 = vcmp.eq.s32.totalorder %v5283_v31, %v5183_v47  ;;  %v550_v41 = vand.u32 4294901760, %v549_v7  ;;  %v568_v52 = vand.u32 4294901760, %v5277_v30 }
  0xae   : > { %4201 = vmatprep.subr.bf16.mxu1 %v5068_v32  ;;  %v3270_v1 = vsel %vm322_vm8, 1.0, %v6881_v0  ;;  %v3269_v8 = vsel %vm321_vm9, 1.0, %v6881_v0  ;;  %v578_v38 = vand.u32 4294901760, %v5275_v15  ;;  %4299 = vmatpush3.bf16.msra.mxu0 %v5062_v17  ;;  %v560_v61 = vand.u32 4294901760, %v559_v45 }
  0xaf   : > { %v5302_v39 = vsub.f32 %v3270_v1, %v3270_v1  ;;  %v5304_v28 = vsub.f32 %v3269_v8, %v3269_v8  ;;  %3720 = vmatmul.mubr.f32.gmra.mrb[2].mxu1 %v540_v36  ;;  %3963 = vmatmul.mubr.f32.gmra.mrb[4].mxu0 %v558_v2  ;;  %v569_v3 = vsub.f32 %v5277_v30, %v568_v52  ;;  %v7003_v36 = vmov 0.0  }
  0xb0   : > { %v5307_v4 = vpop.permute.xlu1 %251  ;;  %3722 = vmatprep.mubr.f32.mxu1 %v550_v41  ;;  %3965 = vmatprep.mubr.f32.mxu0 %v568_v52  ;;  %v5309_v7 = vpop.permute.xlu0 %248  ;;  %v579_v0 = vsub.f32 %v5275_v15, %v578_v38  ;;  %v7061_v18 = vld [vmem:[#allocation10_spill] sm:$0xff] }
  0xb1   : > { %7001 = vst [vmem:[#allocation13_spill] sm:$0xff] %v5302_v39  ;;  %7002 = vst [vmem:[#allocation14_spill] sm:$0xff] %v5304_v28  ;;  %vm6935_vm10 = vcmp.eq.s32.totalorder %v5307_v4, %v5183_v47  ;;  %vm6933_vm11 = vcmp.eq.s32.totalorder %v5309_v7, %v5183_v47  ;;  %4203 = vmatpush3.bf16.msra.mxu1 %v5068_v32  ;;  %v570_v17 = vand.u32 4294901760, %v569_v3  ;;  %v588_v2 = vand.u32 4294901760, %v5304_v28 }
  0xb2   : > { %4301 = vmatprep.subr.bf16.mxu0 %v5086_v12  ;;  %v3272_v45 = vsel %vm6935_vm10, 1.0, %v7003_v36  ;;  %v3271_v41 = vsel %vm6933_vm11, 1.0, %v7003_v36  ;;  %v598_v52 = vand.u32 4294901760, %v5302_v39  ;;  %4205 = vmatprep.subr.bf16.mxu1 %v5090_v57  ;;  %v580_v30 = vand.u32 4294901760, %v579_v0 }
  0xb3   : > { %4303 = vmatpush3.bf16.msra.mxu0 %v5086_v12  ;;  %v5330_v32 = vsub.f32 %v3272_v45, %v3272_v45  ;;  %v5332_v1 = vsub.f32 %v3271_v41, %v3271_v41  ;;  %3723 = vmatmul.mubr.f32.gmra.mrb[4].mxu1 %v560_v61  ;;  %v589_v8 = vsub.f32 %v5304_v28, %v588_v2 }
  0xb4   : > { %3966 = vmatmul.mubr.f32.gmra.mrb[6].mxu0 %v578_v38  ;;  %v5335_v3 = vpop.permute.xlu1 %257  ;;  %3725 = vmatprep.mubr.f32.mxu1 %v570_v17  ;;  %v5337_v15 = vpop.permute.xlu0 %254  ;;  %v599_v46 = vsub.f32 %v5302_v39, %v598_v52  ;;  %v7064_v27 = vld [vmem:[#allocation11_spill] sm:$0xff] }
  0xb5   : > { %7004 = vst [vmem:[#allocation15_spill] sm:$0xff] %v5330_v32  ;;  %7005 = vst [vmem:[#allocation16_spill] sm:$0xff] %v5332_v1  ;;  %3968 = vmatprep.mubr.f32.mxu0 %v588_v2  ;;  %vm6936_vm12 = vcmp.eq.s32.totalorder %v5335_v3, %v5183_v47  ;;  %vm6934_vm13 = vcmp.eq.s32.totalorder %v5337_v15, %v5183_v47  ;;  %v590_v12 = vand.u32 4294901760, %v589_v8  ;;  %v608_v61 = vand.u32 4294901760, %v5332_v1 }
  0xb6   : > { %4207 = vmatpush3.bf16.msra.mxu1 %v5090_v57  ;;  %4305 = vmatprep.subr.bf16.mxu0 %v5108_v20  ;;  %v3274_v0 = vsel %vm6936_vm12, 1.0, %v7003_v36  ;;  %v3273_v38 = vsel %vm6934_vm13, 1.0, %v7003_v36  ;;  %v618_v17 = vand.u32 4294901760, %v5330_v32  ;;  %v600_v39 = vand.u32 4294901760, %v599_v46 }
  0xb7   : > { %4209 = vmatprep.subr.bf16.mxu1 %v5112_v9  ;;  %4307 = vmatpush3.bf16.msra.mxu0 %v5108_v20  ;;  %v5358_v2 = vsub.f32 %v3274_v0, %v3274_v0  ;;  %v5360_v57 = vsub.f32 %v3273_v38, %v3273_v38  ;;  %v609_v45 = vsub.f32 %v5332_v1, %v608_v61 }
  0xb8   : > { %3726 = vmatmul.mubr.f32.gmra.mrb[6].mxu1 %v580_v30  ;;  %3969 = vmatmul.mubr.f32.gmra.mrb[8].mxu0 %v598_v52  ;;  %v5363_v41 = vpop.permute.xlu1 %263  ;;  %v5365_v8 = vpop.permute.xlu0 %260  ;;  %v619_v28 = vsub.f32 %v5330_v32, %v618_v17  ;;  %v7067_v53 = vld [vmem:[#allocation13_spill] sm:$0xff] }
  0xb9   : > { %7006 = vst [vmem:[#allocation17_spill] sm:$0xff] %v5358_v2  ;;  %7007 = vst [vmem:[#allocation18_spill] sm:$0xff] %v5360_v57  ;;  %3728 = vmatprep.mubr.f32.mxu1 %v590_v12  ;;  %3971 = vmatprep.mubr.f32.mxu0 %v608_v61  ;;  %vm6890_vm14 = vcmp.eq.s32.totalorder %v5363_v41, %v5183_v47  ;;  %vm6891_vm15 = vcmp.eq.s32.totalorder %v5365_v8, %v5183_v47  ;;  %v610_v20 = vand.u32 4294901760, %v609_v45 }
  0xba   : > { %v628_v30 = vand.u32 4294901760, %v5360_v57  ;;  %4211 = vmatpush3.bf16.msra.mxu1 %v5112_v9  ;;  %4309 = vmatprep.subr.bf16.mxu0 %v5122_v54  ;;  %v3276_v46 = vsel %vm6890_vm14, 1.0, %v7003_v36  ;;  %v3275_v52 = vsel %vm6891_vm15, 1.0, %v7003_v36  ;;  %v638_v12 = vand.u32 4294901760, %v5358_v2 }
  0xbb   : > { %4213 = vmatprep.subr.bf16.mxu1 %v5126_v13  ;;  %4311 = vmatpush3.bf16.msra.mxu0 %v5122_v54  ;;  %v5386_v61 = vsub.f32 %v3276_v46, %v3276_v46  ;;  %v5388_v9 = vsub.f32 %v3275_v52, %v3275_v52  ;;  %v620_v32 = vand.u32 4294901760, %v619_v28 }
  0xbc   : > { %3729 = vmatmul.mubr.f32.gmra.mrb[8].mxu1 %v600_v39  ;;  %3972 = vmatmul.mubr.f32.gmra.mrb[10].mxu0 %v618_v17  ;;  %v629_v0 = vsub.f32 %v5360_v57, %v628_v30  ;;  %v5391_v38 = vpop.permute.xlu1 %269  ;;  %v5393_v45 = vpop.permute.xlu0 %266  ;;  %v639_v1 = vsub.f32 %v5358_v2, %v638_v12  ;;  %v7069_v31 = vld [vmem:[#allocation16_spill] sm:$0xff]  ;;  %v7071_v6 = vld [vmem:[#allocation15_spill] sm:$0xff] }
  0xbd   : > { %7008 = vst [vmem:[#allocation19_spill] sm:$0xff] %v5386_v61  ;;  %7009 = vst [vmem:[#allocation20_spill] sm:$0xff] %v5388_v9  ;;  %3731 = vmatprep.mubr.f32.mxu1 %v610_v20  ;;  %3974 = vmatprep.mubr.f32.mxu0 %v628_v30  ;;  %vm6894_vm14 = vcmp.eq.s32.totalorder %v5391_v38, %v5183_v47  ;;  %vm6895_vm15 = vcmp.eq.s32.totalorder %v5393_v45, %v5183_v47  ;;  %v648_v39 = vand.u32 4294901760, %v5388_v9 }
  0xbe   : > { %v630_v54 = vand.u32 4294901760, %v629_v0  ;;  %4215 = vmatpush3.bf16.msra.mxu1 %v5126_v13  ;;  %4313 = vmatprep.subr.bf16.mxu0 %v5136_v5  ;;  %v3278_v28 = vsel %vm6894_vm14, 1.0, %v7003_v36  ;;  %v3277_v17 = vsel %vm6895_vm15, 1.0, %v7003_v36  ;;  %v658_v20 = vand.u32 4294901760, %v5386_v61 }
  0xbf   : > { %4217 = vmatprep.subr.bf16.mxu1 %v5144_v34  ;;  %4315 = vmatpush3.bf16.msra.mxu0 %v5136_v5  ;;  %v5414_v30 = vsub.f32 %v3278_v28, %v3278_v28  ;;  %v5416_v13 = vsub.f32 %v3277_v17, %v3277_v17  ;;  %v649_v46 = vsub.f32 %v5388_v9, %v648_v39  ;;  %v640_v2 = vand.u32 4294901760, %v639_v1 }
  0xc0   : > { %3732 = vmatmul.mubr.f32.gmra.mrb[10].mxu1 %v620_v32  ;;  %3975 = vmatmul.mubr.f32.gmra.mrb[12].mxu0 %v638_v12  ;;  %v5419_v52 = vpop.permute.xlu1 %275  ;;  %v5421_v0 = vpop.permute.xlu0 %272  ;;  %v659_v57 = vsub.f32 %v5386_v61, %v658_v20 }
  0xc1   : > { %7010 = vst [vmem:[#allocation21_spill] sm:$0xff] %v5414_v30  ;;  %7011 = vst [vmem:[#allocation22_spill] sm:$0xff] %v5416_v13  ;;  %3734 = vmatprep.mubr.f32.mxu1 %v630_v54  ;;  %3977 = vmatprep.mubr.f32.mxu0 %v648_v39  ;;  %vm6898_vm14 = vcmp.eq.s32.totalorder %v5419_v52, %v5183_v47  ;;  %vm6899_vm15 = vcmp.eq.s32.totalorder %v5421_v0, %v5183_v47  ;;  %v650_v5 = vand.u32 4294901760, %v649_v46 }
  0xc2   : > { %v668_v32 = vand.u32 4294901760, %v5416_v13  ;;  %4219 = vmatpush3.bf16.msra.mxu1 %v5144_v34  ;;  %4317 = vmatprep.subr.bf16.mxu0 %v5146_v25  ;;  %v3280_v1 = vsel %vm6898_vm14, 1.0, %v7003_v36  ;;  %v3279_v12 = vsel %vm6899_vm15, 1.0, %v7003_v36  ;;  %v678_v54 = vand.u32 4294901760, %v5414_v30 }
  0xc3   : > { %4221 = vmatprep.subr.bf16.mxu1 %v5154_v42  ;;  %4319 = vmatpush3.bf16.msra.mxu0 %v5146_v25  ;;  %v5442_v39 = vsub.f32 %v3280_v1, %v3280_v1  ;;  %v5444_v34 = vsub.f32 %v3279_v12, %v3279_v12  ;;  %v660_v61 = vand.u32 4294901760, %v659_v57 }
  0xc4   : > { %3735 = vmatmul.mubr.f32.gmra.mrb[12].mxu1 %v640_v2  ;;  %3978 = vmatmul.mubr.f32.gmra.mrb[14].mxu0 %v658_v20  ;;  %v669_v28 = vsub.f32 %v5416_v13, %v668_v32  ;;  %v5447_v17 = vpop.permute.xlu1 %281  ;;  %v5449_v46 = vpop.permute.xlu0 %278  ;;  %v679_v9 = vsub.f32 %v5414_v30, %v678_v54 }
  0xc5   : > { %7012 = vst [vmem:[#allocation23_spill] sm:$0xff] %v5442_v39  ;;  %7013 = vst [vmem:[#allocation24_spill] sm:$0xff] %v5444_v34  ;;  %3737 = vmatprep.mubr.f32.mxu1 %v650_v5  ;;  %3980 = vmatprep.mubr.f32.mxu0 %v668_v32  ;;  %vm6902_vm14 = vcmp.eq.s32.totalorder %v5447_v17, %v5183_v47  ;;  %vm6903_vm15 = vcmp.eq.s32.totalorder %v5449_v46, %v5183_v47  ;;  %v688_v2 = vand.u32 4294901760, %v5444_v34 }
  0xc6   : > { %v670_v25 = vand.u32 4294901760, %v669_v28  ;;  %4223 = vmatpush3.bf16.msra.mxu1 %v5154_v42  ;;  %4321 = vmatprep.subr.bf16.mxu0 %v5156_v22  ;;  %v3282_v57 = vsel %vm6902_vm14, 1.0, %v7003_v36  ;;  %v3281_v20 = vsel %vm6903_vm15, 1.0, %v7003_v36  ;;  %v698_v5 = vand.u32 4294901760, %v5442_v39 }
  0xc7   : > { %4225 = vmatprep.subr.bf16.mxu1 %v5158_v10  ;;  %4323 = vmatpush3.bf16.msra.mxu0 %v5156_v22  ;;  %v5470_v32 = vsub.f32 %v3282_v57, %v3282_v57  ;;  %v5472_v42 = vsub.f32 %v3281_v20, %v3281_v20  ;;  %v689_v1 = vsub.f32 %v5444_v34, %v688_v2  ;;  %v680_v30 = vand.u32 4294901760, %v679_v9 }
  0xc8   : > { %3738 = vmatmul.mubr.f32.gmra.mrb[14].mxu1 %v660_v61  ;;  %3981 = vmatmul.mubr.f32.gmra.mrb[16].mxu0 %v678_v54  ;;  %v5475_v12 = vpop.permute.xlu1 %287  ;;  %v5477_v28 = vpop.permute.xlu0 %284  ;;  %v699_v13 = vsub.f32 %v5442_v39, %v698_v5 }
  0xc9   : > { %7014 = vst [vmem:[#allocation25_spill] sm:$0xff] %v5470_v32  ;;  %7015 = vst [vmem:[#allocation26_spill] sm:$0xff] %v5472_v42  ;;  %3740 = vmatprep.mubr.f32.mxu1 %v670_v25  ;;  %3983 = vmatprep.mubr.f32.mxu0 %v688_v2  ;;  %vm6906_vm14 = vcmp.eq.s32.totalorder %v5475_v12, %v5183_v47  ;;  %vm6907_vm15 = vcmp.eq.s32.totalorder %v5477_v28, %v5183_v47  ;;  %v690_v22 = vand.u32 4294901760, %v689_v1 }
  0xca   : > { %v708_v61 = vand.u32 4294901760, %v5472_v42  ;;  %4227 = vmatpush3.bf16.msra.mxu1 %v5158_v10  ;;  %4325 = vmatprep.subr.bf16.mxu0 %v4871_v11  ;;  %v3284_v9 = vsel %vm6906_vm14, 1.0, %v7003_v36  ;;  %v3283_v54 = vsel %vm6907_vm15, 1.0, %v7003_v36  ;;  %v718_v25 = vand.u32 4294901760, %v5470_v32 }
  0xcb   : > { %4229 = vmatprep.subr.bf16.mxu1 %v5162_v43  ;;  %v5497_v2 = vsub.f32 %v3284_v9, %v3284_v9  ;;  %v5499_v57 = vsub.f32 %v3283_v54, %v3283_v54  ;;  %v700_v39 = vand.u32 4294901760, %v699_v13 }
  0xcc   : > { %3741 = vmatmul.mubr.f32.gmra.mrb[16].mxu1 %v680_v30  ;;  %3984 = vmatmul.mubr.f32.gmra.mrb[18].mxu0 %v698_v5  ;;  %v709_v10 = vsub.f32 %v5472_v42, %v708_v61  ;;  %v5502_v20 = vpop.permute.xlu1 %293  ;;  %v5504_v1 = vpop.permute.xlu0 %290  ;;  %v719_v34 = vsub.f32 %v5470_v32, %v718_v25 }
  0xcd   : > { %7016 = vst [vmem:[#allocation27_spill] sm:$0xff] %v5497_v2  ;;  %7017 = vst [vmem:[#allocation28_spill] sm:$0xff] %v5499_v57  ;;  %3743 = vmatprep.mubr.f32.mxu1 %v690_v22  ;;  %3986 = vmatprep.mubr.f32.mxu0 %v708_v61  ;;  %vm6912_vm14 = vcmp.eq.s32.totalorder %v5502_v20, %v5183_v47  ;;  %vm6913_vm15 = vcmp.eq.s32.totalorder %v5504_v1, %v5183_v47  ;;  %v728_v30 = vand.u32 4294901760, %v5499_v57 }
  0xce   : > { %v710_v9 = vand.u32 4294901760, %v709_v10  ;;  %v3286_v5 = vsel %vm6912_vm14, 1.0, %v7003_v36  ;;  %v3285_v13 = vsel %vm6913_vm15, 1.0, %v7003_v36  ;;  %v738_v22 = vand.u32 4294901760, %v5497_v2 }
  0xcf   : > { %v5521_v61 = vsub.f32 %v3286_v5, %v3286_v5  ;;  %v5523_v54 = vsub.f32 %v3285_v13, %v3285_v13  ;;  %v729_v10 = vsub.f32 %v5499_v57, %v728_v30  ;;  %v720_v37 = vand.u32 4294901760, %v719_v34 }
  0xd0   : > { %3744 = vmatmul.mubr.f32.gmra.mrb[18].mxu1 %v700_v39  ;;  %3987 = vmatmul.mubr.f32.gmra.mrb[20].mxu0 %v718_v25  ;;  %v5526_v32 = vpop.permute.xlu1 %299  ;;  %v5528_v42 = vpop.permute.xlu0 %296  ;;  %v739_v16 = vsub.f32 %v5497_v2, %v738_v22 }
  0xd1   : > { %7018 = vst [vmem:[#allocation29_spill] sm:$0xff] %v5521_v61  ;;  %7019 = vst [vmem:[#allocation30_spill] sm:$0xff] %v5523_v54  ;;  %3746 = vmatprep.mubr.f32.mxu1 %v710_v9  ;;  %3989 = vmatprep.mubr.f32.mxu0 %v728_v30  ;;  %vm6918_vm14 = vcmp.eq.s32.totalorder %v5526_v32, %v5183_v47  ;;  %vm6919_vm15 = vcmp.eq.s32.totalorder %v5528_v42, %v5183_v47  ;;  %v730_v5 = vand.u32 4294901760, %v729_v10 }
  0xd2   : > { %v748_v39 = vand.u32 4294901760, %v5523_v54  ;;  %v3288_v25 = vsel %vm6918_vm14, 1.0, %v7003_v36  ;;  %v3287_v34 = vsel %vm6919_vm15, 1.0, %v7003_v36  ;;  %v758_v9 = vand.u32 4294901760, %v5521_v61 }
  0xd3   : > { %v5545_v30 = vsub.f32 %v3288_v25, %v3288_v25  ;;  %v5547_v13 = vsub.f32 %v3287_v34, %v3287_v34  ;;  %v740_v59 = vand.u32 4294901760, %v739_v16 }
  0xd4   : > { %3747 = vmatmul.mubr.f32.gmra.mrb[20].mxu1 %v720_v37  ;;  %3990 = vmatmul.mubr.f32.gmra.mrb[22].mxu0 %v738_v22  ;;  %v749_v10 = vsub.f32 %v5523_v54, %v748_v39  ;;  %v5550_v2 = vpop.permute.xlu1 %305  ;;  %v5552_v57 = vpop.permute.xlu0 %302  ;;  %v759_v29 = vsub.f32 %v5521_v61, %v758_v9 }
  0xd5   : > { %7020 = vst [vmem:[#allocation31_spill] sm:$0xff] %v5545_v30  ;;  %7021 = vst [vmem:[#allocation32_spill] sm:$0xff] %v5547_v13  ;;  %3749 = vmatprep.mubr.f32.mxu1 %v730_v5  ;;  %3992 = vmatprep.mubr.f32.mxu0 %v748_v39  ;;  %vm6925_vm14 = vcmp.eq.s32.totalorder %v5550_v2, %v5183_v47  ;;  %vm6926_vm15 = vcmp.eq.s32.totalorder %v5552_v57, %v5183_v47  ;;  %v768_v37 = vand.u32 4294901760, %v5547_v13 }
  0xd6   : > { %7022 = vst [vmem:[#allocation33_spill] sm:$0xff] %v5550_v2  ;;  %7023 = vst [vmem:[#allocation34_spill] sm:$0xff] %v5552_v57  ;;  %v750_v25 = vand.u32 4294901760, %v749_v10  ;;  %v3290_v22 = vsel %vm6925_vm14, 1.0, %v7003_v36  ;;  %v3289_v16 = vsel %vm6926_vm15, 1.0, %v7003_v36  ;;  %v778_v5 = vand.u32 4294901760, %v5545_v30 }
  0xd7   : > { %v5569_v39 = vsub.f32 %v3290_v22, %v3290_v22  ;;  %v5571_v34 = vsub.f32 %v3289_v16, %v3289_v16  ;;  %v769_v10 = vsub.f32 %v5547_v13, %v768_v37  ;;  %v760_v60 = vand.u32 4294901760, %v759_v29 }
  0xd8   : > { %3750 = vmatmul.mubr.f32.gmra.mrb[22].mxu1 %v740_v59  ;;  %3993 = vmatmul.mubr.f32.gmra.mrb[24].mxu0 %v758_v9  ;;  %v5574_v61 = vpop.permute.xlu1 %311  ;;  %v5576_v54 = vpop.permute.xlu0 %308  ;;  %v779_v2 = vsub.f32 %v5545_v30, %v778_v5  ;;  %v4759_v22 = vmov 1   ;;  %v2431_v30 = vld [vmem:[%s4896_s27] sm:$0xff] }
  0xd9   : > { %7024 = vst [vmem:[#allocation35_spill] sm:$0xff] %v5574_v61  ;;  %3752 = vmatprep.mubr.f32.mxu1 %v750_v25  ;;  %3995 = vmatprep.mubr.f32.mxu0 %v768_v37  ;;  %vm344_vm14 = vcmp.eq.s32.totalorder %v5574_v61, %v5183_v47  ;;  %vm343_vm15 = vcmp.eq.s32.totalorder %v5576_v54, %v5183_v47  ;;  %v770_v59 = vand.u32 4294901760, %v769_v10  ;;  %v788_v9 = vand.u32 4294901760, %v5571_v34 }
  0xda   : > { %4563 = vset.pattern.permute.xlu1 %v4759_v22  ;;  %4564 = vset.pattern.permute.xlu0 %v4759_v22  ;;  %v3292_v29 = vsel %vm344_vm14, 1.0, %v7003_v36  ;;  %v3291_v25 = vsel %vm343_vm15, 1.0, %v7003_v36  ;;  %v798_v37 = vand.u32 4294901760, %v5569_v39  ;;  %v780_v13 = vand.u32 4294901760, %v779_v2 }
  0xdb   : > { %v5593_v16 = vsub.f32 %v3292_v29, %v3292_v29  ;;  %v5595_v10 = vsub.f32 %v3291_v25, %v3291_v25  ;;  %v789_v22 = vsub.f32 %v5571_v34, %v788_v9  ;;  %2784 = vperm.xlu1 %4563, %v2431_v30   ;;  %v2434_v25 = vld [vmem:[%s4896_s27 + $0x18] sm:$0xff] }
  0xdc   : > { %3753 = vmatmul.mubr.f32.gmra.mrb[24].mxu1 %v760_v60  ;;  %3996 = vmatmul.mubr.f32.gmra.mrb[26].mxu0 %v778_v5  ;;  %v799_v36 = vsub.f32 %v5569_v39, %v798_v37  ;;  %v2433_v5 = vld [vmem:[%s4896_s27 + $0x10] sm:$0xff] }
  0xdd   : > { %3755 = vmatprep.mubr.f32.mxu1 %v770_v59  ;;  %3998 = vmatprep.mubr.f32.mxu0 %v788_v9  ;;  %v790_v61 = vand.u32 4294901760, %v789_v22  ;;  %v808_v57 = vand.u32 4294901760, %v5595_v10  ;;  %v818_v29 = vand.u32 4294901760, %v5593_v16  ;;  %v4760_v22 = vmov 1.0  }
  0xde   : > { %v800_v59 = vand.u32 4294901760, %v799_v36  ;;  %v2453_v36 = vld [vmem:[%s4896_s27 + $0xb0] sm:$0xff] }
  0xdf   : > { %v809_v60 = vsub.f32 %v5595_v10, %v808_v57  ;;  %v819_v2 = vsub.f32 %v5593_v16, %v818_v29  ;;  %2790 = vperm.xlu1 %4563, %v2433_v5   ;;  %v7057_v5 = vld [vmem:[#allocation6_spill] sm:$0xff] }
  0xe0   : > { %3756 = vmatmul.mubr.f32.gmra.mrb[26].mxu1 %v780_v13  ;;  %3999 = vmatmul.mubr.f32.gmra.mrb[28].mxu0 %v798_v37  ;;  %v2448_v13 = vld [vmem:[%s4896_s27 + $0x88] sm:$0xff] }
  0xe1   : > { %3758 = vmatprep.mubr.f32.mxu1 %v790_v61  ;;  %4001 = vmatprep.mubr.f32.mxu0 %v808_v57  ;;  %v810_v9 = vand.u32 4294901760, %v809_v60  ;;  %v820_v30 = vand.u32 4294901760, %v819_v2  ;;  %v2435_v57 = vld [vmem:[%s4896_s27 + $0x20] sm:$0xff]  ;;  %v2436_v61 = vld [vmem:[%s4896_s27 + $0x28] sm:$0xff]  ;;  %v7060_v2 = vld [vmem:[#allocation7_spill] sm:$0xff] }
  0xe2   : > { %v2455_v60 = vld [vmem:[%s4896_s27 + $0xc0] sm:$0xff] }
  0xe3   : > { %2793 = vperm.xlu1 %4563, %v2434_v25   ;;  %v7062_v25 = vld [vmem:[#allocation9_spill] sm:$0xff] }
  0xe4   : > { %3759 = vmatmul.mubr.f32.gmra.mrb[28].mxu1 %v800_v59  ;;  %4002 = vmatmul.mubr.f32.gmra.mrb[30].mxu0 %v818_v29  ;;  %v2450_v29 = vld [vmem:[%s4896_s27 + $0x98] sm:$0xff] }
  0xe5   : > { %3761 = vmatprep.mubr.f32.mxu1 %v810_v9  ;;  %4036 = vmatprep.mubr.msk.f32.mxu0 %vm313_vm1, %v4760_v22  ;;  %v7058_v59 = vld [vmem:[#allocation8_spill] sm:$0xff]  ;;  %v7059_v9 = vld [vmem:[#allocation5_spill] sm:$0xff] }
  0xe7   : > { %2796 = vperm.xlu1 %4563, %v2435_v57   ;;  %v7065_v57 = vld [vmem:[#allocation14_spill] sm:$0xff] }
  0xe8   : > { %3762 = vmatmul.mubr.f32.gmra.mrb[30].mxu1 %v820_v30  ;;  %4037 = vmatmul.mubr.msk.f32.vlgmr.msra.gmra.mrb[0].mxu0 %vm314_vm3, %v4760_v22  ;;  %v7063_v30 = vld [vmem:[#allocation12_spill] sm:$0xff] }
  0xe9   : > { %3796 = vmatprep.mubr.msk.f32.mxu1 %vm313_vm1, %v4760_v22  ;;  %4039 = vmatprep.mubr.msk.f32.mxu0 %vm315_vm0, %v4760_v22 }
  0xea   : > { %4327 = vmatpush3.bf16.msra.mxu0 %v4871_v11  ;;  %v2437_v11 = vld [vmem:[%s4896_s27 + $0x30] sm:$0xff] }
  0xeb   : > { %4329 = vmatprep.subr.bf16.mxu0 %v4879_v14  ;;  %2799 = vperm.xlu1 %4563, %v2436_v61  }
  0xec   : > { %3797 = vmatmul.mubr.msk.f32.vlgmr.msra.gmra.mrb[0].mxu1 %vm314_vm3, %v4760_v22  ;;  %4040 = vmatmul.mubr.msk.f32.gmra.mrb[2].mxu0 %vm316_vm2, %v4760_v22 }
  0xed   : > { %4231 = vmatpush3.bf16.msra.mxu1 %v5162_v43  ;;  %3799 = vmatprep.mubr.msk.f32.mxu1 %vm315_vm0, %v4760_v22  ;;  %v2442_v43 = vld [vmem:[%s4896_s27 + $0x58] sm:$0xff] }
  0xee   : > { %4042 = vmatprep.mubr.msk.f32.mxu0 %vm317_vm5, %v4760_v22  ;;  %4233 = vmatprep.subr.bf16.mxu1 %v5166_v44 }
  0xef   : > { %4331 = vmatpush3.bf16.msra.mxu0 %v4879_v14  ;;  %v2432_v14 = vld [vmem:[%s4896_s27 + $0x8] sm:$0xff]  ;;  %2802 = vperm.xlu1 %4563, %v2437_v11  }
  0xf0   : > { %3800 = vmatmul.mubr.msk.f32.gmra.mrb[2].mxu1 %vm316_vm2, %v4760_v22  ;;  %4043 = vmatmul.mubr.msk.f32.gmra.mrb[4].mxu0 %vm318_vm4, %v4760_v22 }
  0xf1   : > { %3802 = vmatprep.mubr.msk.f32.mxu1 %vm317_vm5, %v4760_v22  ;;  %4045 = vmatprep.mubr.msk.f32.mxu0 %vm319_vm7, %v4760_v22 }
  0xf2   : > { %4235 = vmatpush3.bf16.msra.mxu1 %v5166_v44  ;;  %4333 = vmatprep.subr.bf16.mxu0 %v4908_v19  ;;  %v2447_v44 = vld [vmem:[%s4896_s27 + $0x80] sm:$0xff] }
  0xf3   : > { %4237 = vmatprep.subr.bf16.mxu1 %v5170_v50  ;;  %4335 = vmatpush3.bf16.msra.mxu0 %v4908_v19  ;;  %v2438_v19 = vld [vmem:[%s4896_s27 + $0x38] sm:$0xff] }
  0xf4   : > { %3803 = vmatmul.mubr.msk.f32.gmra.mrb[4].mxu1 %vm318_vm4, %v4760_v22  ;;  %4046 = vmatmul.mubr.msk.f32.gmra.mrb[6].mxu0 %vm320_vm6, %v4760_v22 }
  0xf5   : > { %3805 = vmatprep.mubr.msk.f32.mxu1 %vm319_vm7, %v4760_v22  ;;  %4048 = vmatprep.mubr.msk.f32.mxu0 %vm321_vm9, %v4760_v22 }
  0xf6   : > { %4239 = vmatpush3.bf16.msra.mxu1 %v5170_v50  ;;  %4337 = vmatprep.subr.bf16.mxu0 %v4932_v26  ;;  %v2444_v50 = vld [vmem:[%s4896_s27 + $0x68] sm:$0xff] }
  0xf7   : > { %4241 = vmatprep.subr.bf16.mxu1 %v5174_v51  ;;  %4339 = vmatpush3.bf16.msra.mxu0 %v4932_v26  ;;  %v2441_v26 = vld [vmem:[%s4896_s27 + $0x50] sm:$0xff] }
  0xf8   : > { %3806 = vmatmul.mubr.msk.f32.gmra.mrb[6].mxu1 %vm320_vm6, %v4760_v22  ;;  %4049 = vmatmul.mubr.msk.f32.gmra.mrb[8].mxu0 %vm322_vm8, %v4760_v22 }
  0xf9   : > { %3808 = vmatprep.mubr.msk.f32.mxu1 %vm321_vm9, %v4760_v22  ;;  %4051 = vmatprep.mubr.msk.f32.mxu0 %vm6933_vm11, %v4760_v22 }
  0xfa   : > { %4243 = vmatpush3.bf16.msra.mxu1 %v5174_v51  ;;  %4341 = vmatprep.subr.bf16.mxu0 %v4956_v33  ;;  %v2449_v51 = vld [vmem:[%s4896_s27 + $0x90] sm:$0xff] }
  0xfb   : > { %4245 = vmatprep.subr.bf16.mxu1 %v5176_v55  ;;  %4343 = vmatpush3.bf16.msra.mxu0 %v4956_v33  ;;  %v2439_v33 = vld [vmem:[%s4896_s27 + $0x40] sm:$0xff] }
  0xfc   : > { %3809 = vmatmul.mubr.msk.f32.gmra.mrb[8].mxu1 %vm322_vm8, %v4760_v22  ;;  %4052 = vmatmul.mubr.msk.f32.gmra.mrb[10].mxu0 %vm6935_vm10, %v4760_v22 }
  0xfd   : > { %3811 = vmatprep.mubr.msk.f32.mxu1 %vm6933_vm11, %v4760_v22  ;;  %4054 = vmatprep.mubr.msk.f32.mxu0 %vm6934_vm13, %v4760_v22  ;;  %vm7025_vm11 = vcmp.eq.s32.totalorder %v5365_v8, %v5183_v47 }
  0xfe   : > { %4247 = vmatpush3.bf16.msra.mxu1 %v5176_v55  ;;  %4345 = vmatprep.subr.bf16.mxu0 %v4980_v40  ;;  %v7049_v55 = vld [vmem:[#allocation34_spill] sm:$0xff] }
  0xff   : > { %4249 = vmatprep.subr.bf16.mxu1 %v5178_v56  ;;  %4347 = vmatpush3.bf16.msra.mxu0 %v4980_v40  ;;  %v2443_v40 = vld [vmem:[%s4896_s27 + $0x60] sm:$0xff] }
 0x100   : > { %3812 = vmatmul.mubr.msk.f32.gmra.mrb[10].mxu1 %vm6935_vm10, %v4760_v22  ;;  %4055 = vmatmul.mubr.msk.f32.gmra.mrb[12].mxu0 %vm6936_vm12, %v4760_v22  ;;  %vm7027_vm10 = vcmp.eq.s32.totalorder %v5393_v45, %v5183_v47 }
 0x101   : > { %3814 = vmatprep.mubr.msk.f32.mxu1 %vm6934_vm13, %v4760_v22  ;;  %4057 = vmatprep.mubr.msk.f32.mxu0 %vm7025_vm11, %v4760_v22  ;;  %vm7026_vm13 = vcmp.eq.s32.totalorder %v5363_v41, %v5183_v47 }
 0x102   : > { %4251 = vmatpush3.bf16.msra.mxu1 %v5178_v56  ;;  %4349 = vmatprep.subr.bf16.mxu0 %v5014_v49  ;;  %v2446_v56 = vld [vmem:[%s4896_s27 + $0x78] sm:$0xff] }
 0x103   : > { %4253 = vmatprep.subr.bf16.mxu1 %v5180_v62  ;;  %4351 = vmatpush3.bf16.msra.mxu0 %v5014_v49  ;;  %v2440_v49 = vld [vmem:[%s4896_s27 + $0x48] sm:$0xff] }
 0x104   : > { %3815 = vmatmul.mubr.msk.f32.gmra.mrb[12].mxu1 %vm6936_vm12, %v4760_v22  ;;  %4058 = vmatmul.mubr.msk.f32.gmra.mrb[14].mxu0 %vm7026_vm13, %v4760_v22  ;;  %vm7030_vm12 = vcmp.eq.s32.totalorder %v5421_v0, %v5183_v47 }
 0x105   : > { %3817 = vmatprep.mubr.msk.f32.mxu1 %vm7025_vm11, %v4760_v22  ;;  %4060 = vmatprep.mubr.msk.f32.mxu0 %vm7027_vm10, %v4760_v22  ;;  %vm7028_vm10 = vcmp.eq.s32.totalorder %v5391_v38, %v5183_v47  ;;  %vm7029_vm11 = vcmp.eq.s32.totalorder %v5393_v45, %v5183_v47 }
 0x106   : > { %4255 = vmatpush3.bf16.msra.mxu1 %v5180_v62  ;;  %4353 = vmatprep.subr.bf16.mxu0 %v5032_v58  ;;  %v7052_v62 = vld [vmem:[#allocation33_spill] sm:$0xff] }
 0x107   : > { %4257 = vmatprep.subr.bf16.mxu1 %v5209_v23  ;;  %4355 = vmatpush3.bf16.msra.mxu0 %v5032_v58  ;;  %v2445_v58 = vld [vmem:[%s4896_s27 + $0x70] sm:$0xff] }
 0x108   : > { %3818 = vmatmul.mubr.msk.f32.gmra.mrb[14].mxu1 %vm7026_vm13, %v4760_v22  ;;  %4061 = vmatmul.mubr.msk.f32.gmra.mrb[16].mxu0 %vm7028_vm10, %v4760_v22  ;;  %vm7031_vm13 = vmmov %vm7028_vm10  ;;  %vm7032_vm10 = vcmp.eq.s32.totalorder %v5419_v52, %v5183_v47 }
 0x109   : > { %3820 = vmatprep.mubr.msk.f32.mxu1 %vm7029_vm11, %v4760_v22  ;;  %4063 = vmatprep.mubr.msk.f32.mxu0 %vm7030_vm12, %v4760_v22  ;;  %vm7033_vm11 = vcmp.eq.s32.totalorder %v5449_v46, %v5183_v47 }
 0x10a   : > { %4259 = vmatpush3.bf16.msra.mxu1 %v5209_v23  ;;  %2787 = vperm.xlu0 %4564, %v2432_v14   ;;  %v2451_v23 = vld [vmem:[%s4896_s27 + $0xa0] sm:$0xff] }
 0x10b   : > { %2805 = vperm.xlu1 %4563, %v2438_v19  }
 0x10c   : > { %3821 = vmatmul.mubr.msk.f32.gmra.mrb[16].mxu1 %vm7031_vm13, %v4760_v22  ;;  %4064 = vmatmul.mubr.msk.f32.gmra.mrb[18].mxu0 %vm7032_vm10, %v4760_v22  ;;  %vm7034_vm13 = vmmov %vm7032_vm10  ;;  %vm7035_vm10 = vcmp.eq.s32.totalorder %v5447_v17, %v5183_v47 }
 0x10d   : > { %3823 = vmatprep.mubr.msk.f32.mxu1 %vm7030_vm12, %v4760_v22  ;;  %4066 = vmatprep.mubr.msk.f32.mxu0 %vm7033_vm11, %v4760_v22  ;;  %vm7036_vm12 = vmmov %vm7033_vm11  ;;  %vm7037_vm11 = vcmp.eq.s32.totalorder %v5477_v28, %v5183_v47 }
 0x10e   : > { %2814 = vperm.xlu0 %4564, %v2441_v26  }
 0x10f   : > { %2808 = vperm.xlu1 %4563, %v2439_v33  }
 0x110   : > { %3824 = vmatmul.mubr.msk.f32.gmra.mrb[18].mxu1 %vm7034_vm13, %v4760_v22  ;;  %4067 = vmatmul.mubr.msk.f32.gmra.mrb[20].mxu0 %vm7035_vm10, %v4760_v22  ;;  %vm7038_vm13 = vmmov %vm7035_vm10  ;;  %vm7039_vm10 = vcmp.eq.s32.totalorder %v5475_v12, %v5183_v47 }
 0x111   : > { %3826 = vmatprep.mubr.msk.f32.mxu1 %vm7036_vm12, %v4760_v22  ;;  %4069 = vmatprep.mubr.msk.f32.mxu0 %vm7037_vm11, %v4760_v22  ;;  %vm7040_vm12 = vmmov %vm7037_vm11  ;;  %vm7041_vm11 = vcmp.eq.s32.totalorder %v5504_v1, %v5183_v47 }
 0x112   : > { %2820 = vperm.xlu0 %4564, %v2443_v40  }
 0x113   : > { %2811 = vperm.xlu1 %4563, %v2440_v49  }
 0x114   : > { %3827 = vmatmul.mubr.msk.f32.gmra.mrb[20].mxu1 %vm7038_vm13, %v4760_v22  ;;  %4070 = vmatmul.mubr.msk.f32.gmra.mrb[22].mxu0 %vm7039_vm10, %v4760_v22  ;;  %vm7042_vm13 = vmmov %vm7039_vm10  ;;  %vm7043_vm10 = vcmp.eq.s32.totalorder %v5502_v20, %v5183_v47 }
 0x115   : > { %3829 = vmatprep.mubr.msk.f32.mxu1 %vm7040_vm12, %v4760_v22  ;;  %4072 = vmatprep.mubr.msk.f32.mxu0 %vm7041_vm11, %v4760_v22  ;;  %vm7044_vm12 = vmmov %vm7041_vm11  ;;  %vm7045_vm11 = vcmp.eq.s32.totalorder %v5528_v42, %v5183_v47 }
 0x116   : > { %2826 = vperm.xlu0 %4564, %v2445_v58  }
 0x117   : > { %2817 = vperm.xlu1 %4563, %v2442_v43  }
 0x118   : > { %3830 = vmatmul.mubr.msk.f32.gmra.mrb[22].mxu1 %vm7042_vm13, %v4760_v22  ;;  %4073 = vmatmul.mubr.msk.f32.gmra.mrb[24].mxu0 %vm7043_vm10, %v4760_v22  ;;  %vm7046_vm13 = vmmov %vm7043_vm10  ;;  %vm7047_vm10 = vcmp.eq.s32.totalorder %v5526_v32, %v5183_v47 }
 0x119   : > { %3832 = vmatprep.mubr.msk.f32.mxu1 %vm7044_vm12, %v4760_v22  ;;  %4075 = vmatprep.mubr.msk.f32.mxu0 %vm7045_vm11, %v4760_v22  ;;  %vm7048_vm12 = vmmov %vm7045_vm11  ;;  %vm7050_vm11 = vcmp.eq.s32.totalorder %v7049_v55, %v5183_v47 }
 0x11a   : > { %2832 = vperm.xlu0 %4564, %v2447_v44  }
 0x11b   : > { %2823 = vperm.xlu1 %4563, %v2444_v50  }
 0x11c   : > { %3833 = vmatmul.mubr.msk.f32.gmra.mrb[24].mxu1 %vm7046_vm13, %v4760_v22  ;;  %4076 = vmatmul.mubr.msk.f32.gmra.mrb[26].mxu0 %vm7047_vm10, %v4760_v22  ;;  %vm7051_vm13 = vmmov %vm7047_vm10  ;;  %vm7053_vm10 = vcmp.eq.s32.totalorder %v7052_v62, %v5183_v47 }
 0x11d   : > { %3835 = vmatprep.mubr.msk.f32.mxu1 %vm7048_vm12, %v4760_v22  ;;  %4078 = vmatprep.mubr.msk.f32.mxu0 %vm7050_vm11, %v4760_v22  ;;  %vm7054_vm12 = vmmov %vm7050_vm11 }
 0x11e   : > { %2838 = vperm.xlu0 %4564, %v2449_v51   ;;  %vm7055_vm11 = vmmov %vm7053_vm10 }
 0x11f   : > { %2829 = vperm.xlu1 %4563, %v2446_v56  }
 0x120   : > { %3836 = vmatmul.mubr.msk.f32.gmra.mrb[26].mxu1 %vm7051_vm13, %v4760_v22  ;;  %4079 = vmatmul.mubr.msk.f32.gmra.mrb[28].mxu0 %vm7053_vm10, %v4760_v22  ;;  %vm7086_vm13 = vcmp.eq.s32.totalorder %v5449_v46, %v5183_v47  ;;  %vm7088_vm10 = vcmp.eq.s32.totalorder %v5447_v17, %v5183_v47  ;;  %v7093_v46 = vld [vmem:[#allocation28_spill] sm:$0xff]  ;;  %v7095_v17 = vld [vmem:[#allocation27_spill] sm:$0xff] }
 0x121   : > { %3838 = vmatprep.mubr.msk.f32.mxu1 %vm7054_vm12, %v4760_v22  ;;  %4081 = vmatprep.mubr.msk.f32.mxu0 %vm343_vm15, %v4760_v22  ;;  %vm7090_vm12 = vcmp.eq.s32.totalorder %v5477_v28, %v5183_v47  ;;  %v7097_v28 = vld [vmem:[#allocation30_spill] sm:$0xff] }
 0x122   : > { %2844 = vperm.xlu0 %4564, %v2451_v23  }
 0x123   : > { %2835 = vperm.xlu1 %4563, %v2448_v13  }
 0x124   : > { %3839 = vmatmul.mubr.msk.f32.gmra.mrb[28].mxu1 %vm7055_vm11, %v4760_v22  ;;  %4082 = vmatmul.mubr.msk.f32.gmra.mrb[30].mxu0 %vm344_vm14, %v4760_v22  ;;  %vm7092_vm11 = vcmp.eq.s32.totalorder %v5475_v12, %v5183_v47  ;;  %v7099_v12 = vld [vmem:[#allocation29_spill] sm:$0xff] }
 0x125   : > { %3841 = vmatprep.mubr.msk.f32.mxu1 %vm343_vm15, %v4760_v22  ;;  %4116 = vmatprep.mubr.msk.f32.mxu0 %vm313_vm1, %v4760_v22  ;;  %vm7068_vm1 = vcmp.eq.s32.totalorder %v5307_v4, %v5183_v47  ;;  %v7075_v4 = vld [vmem:[#allocation17_spill] sm:$0xff] }
 0x126   : > { %2850 = vperm.xlu0 %4564, %v2453_v36  }
 0x127   : > { %2841 = vperm.xlu1 %4563, %v2450_v29  }
 0x128   : > { %3842 = vmatmul.mubr.msk.f32.gmra.mrb[30].mxu1 %vm344_vm14, %v4760_v22  ;;  %4117 = vmatmul.mubr.msk.f32.vlgmr.msra.gmra.mrb[0].mxu0 %vm314_vm3, %v4760_v22  ;;  %vm7072_vm3 = vcmp.eq.s32.totalorder %v5335_v3, %v5183_v47  ;;  %v7079_v3 = vld [vmem:[#allocation19_spill] sm:$0xff] }
 0x129   : > { %3876 = vmatprep.mubr.f32.mxu1 %v7057_v5  ;;  %4119 = vmatprep.mubr.msk.f32.mxu0 %vm315_vm0, %v4760_v22  ;;  %vm7066_vm0 = vcmp.eq.s32.totalorder %v5309_v7, %v5183_v47  ;;  %v7073_v7 = vld [vmem:[#allocation18_spill] sm:$0xff] }
 0x12a   : > { %2856 = vperm.xlu0 %4564, %v2455_v60  }
 0x12b   : > { %2847 = vperm.xlu1 %4563, %v2452_v63  }
 0x12c   : > { %3877 = vmatmul.mubr.f32.vlgmr.msra.gmra.mrb[0].mxu1 %v7058_v59  ;;  %4120 = vmatmul.mubr.msk.f32.gmra.mrb[2].mxu0 %vm316_vm2, %v4760_v22  ;;  %vm7070_vm2 = vcmp.eq.s32.totalorder %v5337_v15, %v5183_v47  ;;  %v7077_v15 = vld [vmem:[#allocation20_spill] sm:$0xff] }
 0x12d   : > { %3879 = vmatprep.mubr.f32.mxu1 %v7059_v9  ;;  %4122 = vmatprep.mubr.msk.f32.mxu0 %vm317_vm5, %v4760_v22  ;;  %vm7076_vm5 = vcmp.eq.s32.totalorder %v5363_v41, %v5183_v47  ;;  %v7083_v41 = vld [vmem:[#allocation21_spill] sm:$0xff] }
 0x12e   : > { %2862 = vperm.xlu0 %4564, %v2457_v24  }
 0x12f   : > { %2853 = vperm.xlu1 %4563, %v2454_v48  }
 0x130   : > { %3880 = vmatmul.mubr.f32.gmra.mrb[2].mxu1 %v7060_v2  ;;  %4123 = vmatmul.mubr.msk.f32.gmra.mrb[4].mxu0 %vm318_vm4, %v4760_v22  ;;  %vm7074_vm4 = vcmp.eq.s32.totalorder %v5365_v8, %v5183_v47  ;;  %v7081_v8 = vld [vmem:[#allocation22_spill] sm:$0xff] }
 0x131   : > { %3882 = vmatprep.mubr.f32.mxu1 %v7061_v18  ;;  %4125 = vmatprep.mubr.msk.f32.mxu0 %vm319_vm7, %v4760_v22  ;;  %vm7080_vm7 = vcmp.eq.s32.totalorder %v5391_v38, %v5183_v47  ;;  %v7087_v38 = vld [vmem:[#allocation23_spill] sm:$0xff] }
 0x133   : > { %2859 = vperm.xlu1 %4563, %v2456_v21  }
 0x134   : > { %3883 = vmatmul.mubr.f32.gmra.mrb[4].mxu1 %v7062_v25  ;;  %4126 = vmatmul.mubr.msk.f32.gmra.mrb[6].mxu0 %vm320_vm6, %v4760_v22  ;;  %vm7078_vm6 = vcmp.eq.s32.totalorder %v5393_v45, %v5183_v47  ;;  %v7085_v45 = vld [vmem:[#allocation24_spill] sm:$0xff] }
 0x135   : > { %3885 = vmatprep.mubr.f32.mxu1 %v7063_v30  ;;  %4128 = vmatprep.mubr.msk.f32.mxu0 %vm321_vm9, %v4760_v22  ;;  %vm7084_vm9 = vcmp.eq.s32.totalorder %v5419_v52, %v5183_v47  ;;  %v7091_v52 = vld [vmem:[#allocation25_spill] sm:$0xff] }
 0x137   : > { %2865 = vperm.xlu1 %4563, %v2458_v35  }
 0x138   : > { %3886 = vmatmul.mubr.f32.gmra.mrb[6].mxu1 %v7064_v27  ;;  %4129 = vmatmul.mubr.msk.f32.gmra.mrb[8].mxu0 %vm322_vm8, %v4760_v22  ;;  %vm7082_vm8 = vcmp.eq.s32.totalorder %v5421_v0, %v5183_v47  ;;  %v7089_v0 = vld [vmem:[#allocation26_spill] sm:$0xff] }
 0x139   : > { %3888 = vmatprep.mubr.f32.mxu1 %v7065_v57  ;;  %4131 = vmatprep.mubr.msk.f32.mxu0 %vm7066_vm0, %v4760_v22  ;;  %vm7094_vm0 = vcmp.eq.s32.totalorder %v5504_v1, %v5183_v47  ;;  %v7101_v1 = vld [vmem:[#allocation32_spill] sm:$0xff] }
 0x13c   : > { %3889 = vmatmul.mubr.f32.gmra.mrb[8].mxu1 %v7067_v53  ;;  %4132 = vmatmul.mubr.msk.f32.gmra.mrb[10].mxu0 %vm7068_vm1, %v4760_v22  ;;  %vm7096_vm1 = vcmp.eq.s32.totalorder %v5502_v20, %v5183_v47  ;;  %v7103_v20 = vld [vmem:[#allocation31_spill] sm:$0xff] }
 0x13d   : > { %3891 = vmatprep.mubr.f32.mxu1 %v7069_v31  ;;  %4134 = vmatprep.mubr.msk.f32.mxu0 %vm7070_vm2, %v4760_v22  ;;  %vm7098_vm2 = vcmp.eq.s32.totalorder %v5528_v42, %v5183_v47 }
 0x140   : > { %3892 = vmatmul.mubr.f32.gmra.mrb[10].mxu1 %v7071_v6  ;;  %4135 = vmatmul.mubr.msk.f32.gmra.mrb[12].mxu0 %vm7072_vm3, %v4760_v22  ;;  %vm7100_vm3 = vcmp.eq.s32.totalorder %v5526_v32, %v5183_v47 }
 0x141   : > { %3894 = vmatprep.mubr.f32.mxu1 %v7073_v7  ;;  %4137 = vmatprep.mubr.msk.f32.mxu0 %vm7074_vm4, %v4760_v22  ;;  %vm7102_vm4 = vcmp.eq.s32.totalorder %v7049_v55, %v5183_v47 }
 0x144   : > { %3895 = vmatmul.mubr.f32.gmra.mrb[12].mxu1 %v7075_v4  ;;  %4138 = vmatmul.mubr.msk.f32.gmra.mrb[14].mxu0 %vm7076_vm5, %v4760_v22  ;;  %vm7104_vm5 = vcmp.eq.s32.totalorder %v7052_v62, %v5183_v47 }
 0x145   : > { %3897 = vmatprep.mubr.f32.mxu1 %v7077_v15  ;;  %4140 = vmatprep.mubr.msk.f32.mxu0 %vm7078_vm6, %v4760_v22 }
 0x148   : > { %3898 = vmatmul.mubr.f32.gmra.mrb[14].mxu1 %v7079_v3  ;;  %4141 = vmatmul.mubr.msk.f32.gmra.mrb[16].mxu0 %vm7080_vm7, %v4760_v22 }
 0x149   : > { %3900 = vmatprep.mubr.f32.mxu1 %v7081_v8  ;;  %4143 = vmatprep.mubr.msk.f32.mxu0 %vm7082_vm8, %v4760_v22 }
 0x14c   : > { %3901 = vmatmul.mubr.f32.gmra.mrb[16].mxu1 %v7083_v41  ;;  %4144 = vmatmul.mubr.msk.f32.gmra.mrb[18].mxu0 %vm7084_vm9, %v4760_v22 }
 0x14d   : > { %3903 = vmatprep.mubr.f32.mxu1 %v7085_v45  ;;  %4146 = vmatprep.mubr.msk.f32.mxu0 %vm7086_vm13, %v4760_v22 }
 0x150   : > { %3904 = vmatmul.mubr.f32.gmra.mrb[18].mxu1 %v7087_v38  ;;  %4147 = vmatmul.mubr.msk.f32.gmra.mrb[20].mxu0 %vm7088_vm10, %v4760_v22 }
 0x151   : > { %3906 = vmatprep.mubr.f32.mxu1 %v7089_v0  ;;  %4149 = vmatprep.mubr.msk.f32.mxu0 %vm7090_vm12, %v4760_v22 }
 0x154   : > { %3907 = vmatmul.mubr.f32.gmra.mrb[20].mxu1 %v7091_v52  ;;  %4150 = vmatmul.mubr.msk.f32.gmra.mrb[22].mxu0 %vm7092_vm11, %v4760_v22 }
 0x155   : > { %3909 = vmatprep.mubr.f32.mxu1 %v7093_v46  ;;  %4152 = vmatprep.mubr.msk.f32.mxu0 %vm7094_vm0, %v4760_v22 }
 0x158   : > { %3910 = vmatmul.mubr.f32.gmra.mrb[22].mxu1 %v7095_v17  ;;  %4153 = vmatmul.mubr.msk.f32.gmra.mrb[24].mxu0 %vm7096_vm1, %v4760_v22 }
 0x159   : > { %3912 = vmatprep.mubr.f32.mxu1 %v7097_v28  ;;  %4155 = vmatprep.mubr.msk.f32.mxu0 %vm7098_vm2, %v4760_v22 }
 0x15a   : > { %v6155_v3 = vpop.permute.xlu1 %2784 }
 0x15c   : > { %3913 = vmatmul.mubr.f32.gmra.mrb[24].mxu1 %v7099_v12  ;;  %4156 = vmatmul.mubr.msk.f32.gmra.mrb[26].mxu0 %vm7100_vm3, %v4760_v22 }
 0x15d   : > { %3915 = vmatprep.mubr.f32.mxu1 %v7101_v1  ;;  %4158 = vmatprep.mubr.msk.f32.mxu0 %vm7102_vm4, %v4760_v22 }
 0x160   : > { %3916 = vmatmul.mubr.f32.gmra.mrb[26].mxu1 %v7103_v20  ;;  %4159 = vmatmul.mubr.msk.f32.gmra.mrb[28].mxu0 %vm7104_vm5, %v4760_v22 }
 0x161   : > { %3918 = vmatprep.mubr.f32.mxu1 %v5571_v34  ;;  %4161 = vmatprep.mubr.msk.f32.mxu0 %vm343_vm15, %v4760_v22 }
 0x164   : > { %3919 = vmatmul.mubr.f32.gmra.mrb[28].mxu1 %v5569_v39  ;;  %4162 = vmatmul.mubr.msk.f32.gmra.mrb[30].mxu0 %vm344_vm14, %v4760_v22 }
 0x165   : > { %3921 = vmatprep.mubr.f32.mxu1 %v5595_v10 }
 0x168   : > { %3922 = vmatmul.mubr.f32.gmra.mrb[30].mxu1 %v5593_v16 }
 0x1fb   : > { %v4118_v32 = vpop.f32.mrb[0].mxu0 }
 0x1fc   : > { %v2209_v42 = vpop.f32.mrb[1].mxu0 }
 0x1ff   : > { %v3878_v34 = vpop.f32.mrb[0].mxu1  ;;  %v4121_v61 = vpop.f32.mrb[2].mxu0 }
 0x200   : > { %v6080_v54 = vadd.f32 %v4118_v32, %v3878_v34  ;;  %v1263_v11 = vpop.f32.mrb[1].mxu1  ;;  %v2221_v39 = vpop.f32.mrb[3].mxu0 }
 0x201   : > { %v6082_v14 = vadd.f32 %v2209_v42, %v1263_v11  ;;  %v6177_v32 = vpop.permute.xlu1 %2790 }
 0x202   : > { %2400 = vst [vmem:[%s6084_s28 + $0x8] sm:$0xff] %v6080_v54  ;;  %2465 = vmax.xlane.f32.xlu1 %v6080_v54 }
 0x203   : > { %2399 = vst [vmem:[%s6084_s28] sm:$0xff] %v6082_v14  ;;  %v4124_v16 = vpop.f32.mrb[4].mxu0  ;;  %2463 = vmax.xlane.f32.xlu0 %v6082_v14  ;;  %v3881_v10 = vpop.f32.mrb[2].mxu1 }
 0x204   : > { %v6092_v22 = vadd.f32 %v4121_v61, %v3881_v10  ;;  %v1277_v19 = vpop.f32.mrb[3].mxu1  ;;  %v2233_v26 = vpop.f32.mrb[5].mxu0 }
 0x205   : > { %v6094_v33 = vadd.f32 %v2221_v39, %v1277_v19 }
 0x206   : > { %2402 = vst [vmem:[%s6084_s28 + $0x18] sm:$0xff] %v6092_v22 }
 0x207   : > { %2401 = vst [vmem:[%s6084_s28 + $0x10] sm:$0xff] %v6094_v33  ;;  %v4127_v40 = vpop.f32.mrb[6].mxu0  ;;  %2469 = vmax.xlane.f32.xlu0 %v6092_v22  ;;  %v3884_v49 = vpop.f32.mrb[4].mxu1 }
 0x208   : > { %v6101_v58 = vadd.f32 %v4124_v16, %v3884_v49  ;;  %v1291_v43 = vpop.f32.mrb[5].mxu1  ;;  %v2245_v44 = vpop.f32.mrb[7].mxu0 }
 0x209   : > { %v6103_v50 = vadd.f32 %v2233_v26, %v1291_v43 }
 0x20a   : > { %2404 = vst [vmem:[%s6084_s28 + $0x28] sm:$0xff] %v6101_v58 }
 0x20b   : > { %2403 = vst [vmem:[%s6084_s28 + $0x20] sm:$0xff] %v6103_v50  ;;  %v4130_v51 = vpop.f32.mrb[8].mxu0  ;;  %2467 = vmax.xlane.f32.xlu0 %v6094_v33  ;;  %2471 = vmax.xlane.f32.xlu1 %v6103_v50  ;;  %v3887_v55 = vpop.f32.mrb[6].mxu1 }
 0x20c   : > { %v6111_v56 = vadd.f32 %v4127_v40, %v3887_v55  ;;  %v1305_v62 = vpop.f32.mrb[7].mxu1  ;;  %v2257_v23 = vpop.f32.mrb[9].mxu0 }
 0x20d   : > { %v6113_v13 = vadd.f32 %v2245_v44, %v1305_v62  ;;  %v6199_v44 = vpop.permute.xlu1 %2793 }
 0x20e   : > { %2406 = vst [vmem:[%s6084_s28 + $0x38] sm:$0xff] %v6111_v56 }
 0x20f   : > { %7105 = vst [vmem:[#allocation34_spill] sm:$0xff] %v6113_v13  ;;  %2405 = vst [vmem:[%s6084_s28 + $0x30] sm:$0xff] %v6113_v13  ;;  %v4133_v37 = vpop.f32.mrb[10].mxu0  ;;  %2473 = vmax.xlane.f32.xlu0 %v6101_v58  ;;  %2475 = vmax.xlane.f32.xlu1 %v6113_v13  ;;  %v3890_v36 = vpop.f32.mrb[8].mxu1 }
 0x210   : > { %v6121_v29 = vadd.f32 %v4130_v51, %v3890_v36  ;;  %v1319_v60 = vpop.f32.mrb[9].mxu1  ;;  %v2269_v5 = vpop.f32.mrb[11].mxu0 }
 0x211   : > { %v6123_v63 = vadd.f32 %v2257_v23, %v1319_v60 }
 0x212   : > { %7106 = vst [vmem:[#allocation33_spill] sm:$0xff] %v6121_v29  ;;  %2408 = vst [vmem:[%s6084_s28 + $0x48] sm:$0xff] %v6121_v29 }
 0x213   : > { %7107 = vst [vmem:[#allocation35_spill] sm:$0xff] %v6123_v63  ;;  %2407 = vst [vmem:[%s6084_s28 + $0x40] sm:$0xff] %v6123_v63  ;;  %v4136_v59 = vpop.f32.mrb[12].mxu0  ;;  %2477 = vmax.xlane.f32.xlu0 %v6111_v56  ;;  %2479 = vmax.xlane.f32.xlu1 %v6123_v63  ;;  %v3893_v24 = vpop.f32.mrb[10].mxu1 }
 0x214   : > { %v6131_v9 = vadd.f32 %v4133_v37, %v3893_v24  ;;  %v1333_v48 = vpop.f32.mrb[11].mxu1  ;;  %v2281_v2 = vpop.f32.mrb[13].mxu0 }
 0x215   : > { %v6133_v18 = vadd.f32 %v2269_v5, %v1333_v48 }
 0x216   : > { %7108 = vst [vmem:[#allocation6_spill] sm:$0xff] %v6131_v9  ;;  %2410 = vst [vmem:[%s6084_s28 + $0x58] sm:$0xff] %v6131_v9 }
 0x217   : > { %7109 = vst [vmem:[#allocation8_spill] sm:$0xff] %v6133_v18  ;;  %2409 = vst [vmem:[%s6084_s28 + $0x50] sm:$0xff] %v6133_v18  ;;  %v4139_v21 = vpop.f32.mrb[14].mxu0  ;;  %2481 = vmax.xlane.f32.xlu0 %v6121_v29  ;;  %2483 = vmax.xlane.f32.xlu1 %v6133_v18  ;;  %v3896_v25 = vpop.f32.mrb[12].mxu1 }
 0x218   : > { %v6141_v30 = vadd.f32 %v4136_v59, %v3896_v25  ;;  %v1347_v35 = vpop.f32.mrb[13].mxu1  ;;  %v2293_v27 = vpop.f32.mrb[15].mxu0 }
 0x219   : > { %v6143_v57 = vadd.f32 %v2281_v2, %v1347_v35 }
 0x21a   : > { %2412 = vst [vmem:[%s6084_s28 + $0x68] sm:$0xff] %v6141_v30 }
 0x21b   : > { %7110 = vst [vmem:[#allocation5_spill] sm:$0xff] %v6143_v57  ;;  %2411 = vst [vmem:[%s6084_s28 + $0x60] sm:$0xff] %v6143_v57  ;;  %v4142_v53 = vpop.f32.mrb[16].mxu0  ;;  %2485 = vmax.xlane.f32.xlu0 %v6131_v9  ;;  %2487 = vmax.xlane.f32.xlu1 %v6143_v57  ;;  %v3899_v31 = vpop.f32.mrb[14].mxu1 }
 0x21c   : > { %v6151_v6 = vadd.f32 %v4139_v21, %v3899_v31  ;;  %v1361_v7 = vpop.f32.mrb[15].mxu1  ;;  %v2305_v4 = vpop.f32.mrb[17].mxu0 }
 0x21d   : > { %v6153_v15 = vadd.f32 %v2293_v27, %v1361_v7  ;;  %v6221_v21 = vpop.permute.xlu1 %2796 }
 0x21e   : > { %2414 = vst [vmem:[%s6084_s28 + $0x78] sm:$0xff] %v6151_v6 }
 0x21f   : > { %7111 = vst [vmem:[#allocation7_spill] sm:$0xff] %v6153_v15  ;;  %2413 = vst [vmem:[%s6084_s28 + $0x70] sm:$0xff] %v6153_v15  ;;  %v4145_v8 = vpop.f32.mrb[18].mxu0  ;;  %2489 = vmax.xlane.f32.xlu0 %v6141_v30  ;;  %2491 = vmax.xlane.f32.xlu1 %v6153_v15  ;;  %v3902_v41 = vpop.f32.mrb[16].mxu1 }
 0x220   : > { %v6163_v45 = vadd.f32 %v4142_v53, %v3902_v41  ;;  %v1375_v38 = vpop.f32.mrb[17].mxu1  ;;  %v2317_v0 = vpop.f32.mrb[19].mxu0 }
 0x221   : > { %v6165_v52 = vadd.f32 %v2305_v4, %v1375_v38  ;;  %v6241_v38 = vpop.permute.xlu1 %2799 }
 0x222   : > { %2416 = vst [vmem:[%s6084_s28 + $0x88] sm:$0xff] %v6163_v45 }
 0x223   : > { %7112 = vst [vmem:[#allocation10_spill] sm:$0xff] %v6165_v52  ;;  %2415 = vst [vmem:[%s6084_s28 + $0x80] sm:$0xff] %v6165_v52  ;;  %v4148_v46 = vpop.f32.mrb[20].mxu0  ;;  %2493 = vmax.xlane.f32.xlu0 %v6151_v6  ;;  %2495 = vmax.xlane.f32.xlu1 %v6165_v52  ;;  %v3905_v17 = vpop.f32.mrb[18].mxu1 }
 0x224   : > { %v6173_v28 = vadd.f32 %v4145_v8, %v3905_v17  ;;  %v1389_v12 = vpop.f32.mrb[19].mxu1  ;;  %v2329_v1 = vpop.f32.mrb[21].mxu0 }
 0x225   : > { %v6175_v20 = vadd.f32 %v2317_v0, %v1389_v12  ;;  %v2460_v12 = vld [vmem:[%s4896_s27 + $0xe8] sm:$0xff] }
 0x226   : > { %2418 = vst [vmem:[%s6084_s28 + $0x98] sm:$0xff] %v6173_v28 }
 0x227   : > { %7113 = vst [vmem:[#allocation9_spill] sm:$0xff] %v6175_v20  ;;  %2417 = vst [vmem:[%s6084_s28 + $0x90] sm:$0xff] %v6175_v20  ;;  %v4151_v42 = vpop.f32.mrb[22].mxu0  ;;  %2497 = vmax.xlane.f32.xlu0 %v6163_v45  ;;  %2499 = vmax.xlane.f32.xlu1 %v6175_v20  ;;  %v3908_v34 = vpop.f32.mrb[20].mxu1 }
 0x228   : > { %v6185_v61 = vadd.f32 %v4148_v46, %v3908_v34  ;;  %v1403_v11 = vpop.f32.mrb[21].mxu1  ;;  %v2341_v39 = vpop.f32.mrb[23].mxu0 }
 0x229   : > { %v6187_v16 = vadd.f32 %v2329_v1, %v1403_v11  ;;  %v6251_v46 = vpop.permute.xlu1 %2802  ;;  %v6261_v34 = vpop.permute.xlu0 %2787  ;;  %v2459_v11 = vld [vmem:[%s4896_s27 + $0xe0] sm:$0xff] }
 0x22a   : > { %2420 = vst [vmem:[%s6084_s28 + $0xa8] sm:$0xff] %v6185_v61 }
 0x22b   : > { %7114 = vst [vmem:[#allocation12_spill] sm:$0xff] %v6187_v16  ;;  %2419 = vst [vmem:[%s6084_s28 + $0xa0] sm:$0xff] %v6187_v16  ;;  %v4154_v10 = vpop.f32.mrb[24].mxu0  ;;  %2501 = vmax.xlane.f32.xlu0 %v6173_v28  ;;  %2503 = vmax.xlane.f32.xlu1 %v6187_v16  ;;  %v3911_v19 = vpop.f32.mrb[22].mxu1 }
 0x22c   : > { %v6195_v26 = vadd.f32 %v4151_v42, %v3911_v19  ;;  %v1417_v40 = vpop.f32.mrb[23].mxu1  ;;  %v2353_v49 = vpop.f32.mrb[25].mxu0 }
 0x22d   : > { %v6197_v43 = vadd.f32 %v2341_v39, %v1417_v40  ;;  %v6254_v17 = vpop.permute.xlu1 %2805 }
 0x22e   : > { %2422 = vst [vmem:[%s6084_s28 + $0xb8] sm:$0xff] %v6195_v26 }
 0x22f   : > { %7115 = vst [vmem:[#allocation11_spill] sm:$0xff] %v6197_v43  ;;  %2421 = vst [vmem:[%s6084_s28 + $0xb0] sm:$0xff] %v6197_v43  ;;  %v4157_v51 = vpop.f32.mrb[26].mxu0  ;;  %2505 = vmax.xlane.f32.xlu0 %v6185_v61  ;;  %2507 = vmax.xlane.f32.xlu1 %v6197_v43  ;;  %v3914_v55 = vpop.f32.mrb[24].mxu1 }
 0x230   : > { %v6207_v62 = vadd.f32 %v4154_v10, %v3914_v55  ;;  %v1431_v23 = vpop.f32.mrb[25].mxu1  ;;  %v2365_v37 = vpop.f32.mrb[27].mxu0 }
 0x231   : > { %v6209_v36 = vadd.f32 %v2353_v49, %v1431_v23  ;;  %v6257_v1 = vpop.permute.xlu1 %2808  ;;  %v6266_v10 = vpop.permute.xlu0 %2814 }
 0x232   : > { %7116 = vst [vmem:[#allocation14_spill] sm:$0xff] %v6207_v62  ;;  %2424 = vst [vmem:[%s6084_s28 + $0xc8] sm:$0xff] %v6207_v62 }
 0x233   : > { %7117 = vst [vmem:[#allocation13_spill] sm:$0xff] %v6209_v36  ;;  %2423 = vst [vmem:[%s6084_s28 + $0xc0] sm:$0xff] %v6209_v36  ;;  %v4160_v60 = vpop.f32.mrb[28].mxu0  ;;  %2509 = vmax.xlane.f32.xlu0 %v6195_v26  ;;  %2511 = vmax.xlane.f32.xlu1 %v6209_v36  ;;  %v3917_v5 = vpop.f32.mrb[26].mxu1 }
 0x234   : > { %v6217_v59 = vadd.f32 %v4157_v51, %v3917_v5  ;;  %v1445_v24 = vpop.f32.mrb[27].mxu1  ;;  %v2377_v48 = vpop.f32.mrb[29].mxu0  ;;  %7124 = vst [vmem:[#allocation22_spill] sm:$0xff] %v6266_v10 }
 0x235   : > { %v6219_v2 = vadd.f32 %v2365_v37, %v1445_v24  ;;  %v6259_v42 = vpop.permute.xlu1 %2811  ;;  %v6270_v40 = vpop.permute.xlu0 %2820 }
 0x236   : > { %7118 = vst [vmem:[#allocation16_spill] sm:$0xff] %v6217_v59  ;;  %2426 = vst [vmem:[%s6084_s28 + $0xd8] sm:$0xff] %v6217_v59 }
 0x237   : > { %7119 = vst [vmem:[#allocation15_spill] sm:$0xff] %v6219_v2  ;;  %2425 = vst [vmem:[%s6084_s28 + $0xd0] sm:$0xff] %v6219_v2  ;;  %v4163_v25 = vpop.f32.mrb[30].mxu0  ;;  %2513 = vmax.xlane.f32.xlu0 %v6207_v62  ;;  %2515 = vmax.xlane.f32.xlu1 %v6219_v2  ;;  %v3920_v35 = vpop.f32.mrb[28].mxu1 }
 0x238   : > { %v6229_v27 = vadd.f32 %v4160_v60, %v3920_v35  ;;  %v1459_v53 = vpop.f32.mrb[29].mxu1  ;;  %v2389_v31 = vpop.f32.mrb[31].mxu0  ;;  %7126 = vst [vmem:[#allocation24_spill] sm:$0xff] %v6270_v40 }
 0x239   : > { %v6231_v7 = vadd.f32 %v2377_v48, %v1459_v53  ;;  %v6264_v39 = vpop.permute.xlu1 %2817  ;;  %v6274_v51 = vpop.permute.xlu0 %2826 }
 0x23a   : > { %7120 = vst [vmem:[#allocation18_spill] sm:$0xff] %v6229_v27  ;;  %2428 = vst [vmem:[%s6084_s28 + $0xe8] sm:$0xff] %v6229_v27 }
 0x23b   : > { %7121 = vst [vmem:[#allocation17_spill] sm:$0xff] %v6231_v7  ;;  %2427 = vst [vmem:[%s6084_s28 + $0xe0] sm:$0xff] %v6231_v7  ;;  %2517 = vmax.xlane.f32.xlu0 %v6217_v59  ;;  %2519 = vmax.xlane.f32.xlu1 %v6231_v7  ;;  %v3923_v4 = vpop.f32.mrb[30].mxu1 }
 0x23c   : > { %v6239_v8 = vadd.f32 %v4163_v25, %v3923_v4  ;;  %v1473_v41 = vpop.f32.mrb[31].mxu1  ;;  %7128 = vst [vmem:[#allocation26_spill] sm:$0xff] %v6274_v51 }
 0x23d   : > { %v6243_v0 = vadd.f32 %v2389_v31, %v1473_v41  ;;  %v6268_v19 = vpop.permute.xlu1 %2823  ;;  %v6278_v23 = vpop.permute.xlu0 %2832 }
 0x23e   : > { %7122 = vst [vmem:[#allocation20_spill] sm:$0xff] %v6239_v8  ;;  %2430 = vst [vmem:[%s6084_s28 + $0xf8] sm:$0xff] %v6239_v8 }
 0x23f   : > { %7123 = vst [vmem:[#allocation19_spill] sm:$0xff] %v6243_v0  ;;  %2429 = vst [vmem:[%s6084_s28 + $0xf0] sm:$0xff] %v6243_v0  ;;  %2521 = vmax.xlane.f32.xlu0 %v6229_v27  ;;  %2523 = vmax.xlane.f32.xlu1 %v6243_v0 }
 0x240   : > { %7125 = vst [vmem:[#allocation21_spill] sm:$0xff] %v6268_v19  ;;  %7130 = vst [vmem:[#allocation28_spill] sm:$0xff] %v6278_v23 }
 0x241   : > { %v6272_v49 = vpop.permute.xlu1 %2829  ;;  %v6282_v60 = vpop.permute.xlu0 %2838 }
 0x242   : > { %7127 = vst [vmem:[#allocation23_spill] sm:$0xff] %v6272_v49  ;;  %7132 = vst [vmem:[#allocation30_spill] sm:$0xff] %v6282_v60 }
 0x243   : > { %2525 = vmax.xlane.f32.xlu0 %v6239_v8 }
 0x245   : > { %v6276_v55 = vpop.permute.xlu1 %2835  ;;  %v6286_v24 = vpop.permute.xlu0 %2844 }
 0x246   : > { %7129 = vst [vmem:[#allocation25_spill] sm:$0xff] %v6276_v55  ;;  %7134 = vst [vmem:[#allocation32_spill] sm:$0xff] %v6286_v24 }
 0x249   : > { %v6280_v37 = vpop.permute.xlu1 %2841  ;;  %v6290_v25 = vpop.permute.xlu0 %2850 }
 0x24a   : > { %7131 = vst [vmem:[#allocation27_spill] sm:$0xff] %v6280_v37  ;;  %7136 = vst [vmem:[#allocation36_spill] sm:$0xff] %v6290_v25 }
 0x24d   : > { %v6284_v5 = vpop.permute.xlu1 %2847  ;;  %v6294_v53 = vpop.permute.xlu0 %2856 }
 0x24e   : > { %7133 = vst [vmem:[#allocation29_spill] sm:$0xff] %v6284_v5  ;;  %7138 = vst [vmem:[#allocation38_spill] sm:$0xff] %v6294_v53 }
 0x250   : > { %2871 = vperm.xlu1 %4563, %v2460_v12  }
 0x251   : > { %v6288_v48 = vpop.permute.xlu1 %2853  ;;  %v6298_v4 = vpop.permute.xlu0 %2862 }
 0x252   : > { %7135 = vst [vmem:[#allocation31_spill] sm:$0xff] %v6288_v48  ;;  %7140 = vst [vmem:[#allocation40_spill] sm:$0xff] %v6298_v4 }
 0x255   : > { %v6292_v35 = vpop.permute.xlu1 %2859 }
 0x256   : > { %7137 = vst [vmem:[#allocation37_spill] sm:$0xff] %v6292_v35 }
 0x259   : > { %2868 = vperm.xlu0 %4564, %v2459_v11   ;;  %v6296_v31 = vpop.permute.xlu1 %2865 }
 0x25a   : > { %7139 = vst [vmem:[#allocation39_spill] sm:$0xff] %v6296_v31 }
 0x28f   : > { %v6300_v41 = vpop.xlane.xlu1 %2465 }
 0x290   : > { %v2528_v12 = vsub.f32 %v6080_v54, %v6300_v41  ;;  %v6304_v11 = vpop.xlane.xlu0 %2463 }
 0x291   : > { %v2527_v48 = vsub.f32 %v6082_v14, %v6304_v11 }
 0x292   : > { %v2561_v24 = vmul.f32 1.442695, %v2528_v12 }
 0x293   : > { %v2559_v25 = vmul.f32 1.442695, %v2527_v48 }
 0x294   : > { %4565 = vpow2.f32 %v2561_v24  ;;  %v6308_v35 = vpop.xlane.xlu0 %2469 }
 0x295   : > { %4567 = vpow2.f32 %v2559_v25  ;;  %v2530_v31 = vsub.f32 %v6092_v22, %v6308_v35 }
 0x297   : > { %v2565_v4 = vmul.f32 1.442695, %v2530_v31 }
 0x298   : > { %v6312_v53 = vpop.xlane.xlu1 %2471  ;;  %v6314_v5 = vpop.xlane.xlu0 %2467 }
 0x299   : > { %4569 = vpow2.f32 %v2565_v4  ;;  %v2531_v60 = vsub.f32 %v6103_v50, %v6312_v53  ;;  %v2529_v12 = vsub.f32 %v6094_v33, %v6314_v5 }
 0x29b   : > { %v2563_v48 = vmul.f32 1.442695, %v2529_v12  ;;  %v2567_v25 = vmul.f32 1.442695, %v2531_v60 }
 0x29c   : > { %v6320_v24 = vpop.xlane.xlu1 %2475  ;;  %v6322_v37 = vpop.xlane.xlu0 %2473 }
 0x29d   : > { %v2533_v31 = vsub.f32 %v6113_v13, %v6320_v24  ;;  %v2532_v23 = vsub.f32 %v6101_v58, %v6322_v37  ;;  %4571 = vpow2.f32 %v2563_v48 }
 0x29e   : > { %v4566_v55 = vpop.eup %4565  ;;  %4573 = vpow2.f32 %v2567_v25 }
 0x29f   : > { %v4568_v4 = vpop.eup %4567  ;;  %v2569_v51 = vmul.f32 1.442695, %v2532_v23  ;;  %2625 = vadd.xlane.f32.xlu0 %v4566_v55  ;;  %v2571_v40 = vmul.f32 1.442695, %v2533_v31 }
 0x2a0   : > { %v6328_v49 = vpop.xlane.xlu1 %2479  ;;  %2623 = vadd.xlane.f32.xlu1 %v4568_v4  ;;  %v6330_v12 = vpop.xlane.xlu0 %2477 }
 0x2a1   : > { %7141 = vst [vmem:[#allocation41_spill] sm:$0xff] %v6328_v49  ;;  %v2535_v60 = vsub.f32 %v6123_v63, %v6328_v49  ;;  %v2534_v19 = vsub.f32 %v6111_v56, %v6330_v12  ;;  %4575 = vpow2.f32 %v2569_v51 }
 0x2a2   : > { %4577 = vpow2.f32 %v2571_v40 }
 0x2a3   : > { %v4570_v10 = vpop.eup %4569  ;;  %v2573_v13 = vmul.f32 1.442695, %v2534_v19  ;;  %v2575_v23 = vmul.f32 1.442695, %v2535_v60 }
 0x2a4   : > { %v6336_v48 = vpop.xlane.xlu1 %2483  ;;  %2629 = vadd.xlane.f32.xlu0 %v4570_v10  ;;  %v6338_v55 = vpop.xlane.xlu0 %2481 }
 0x2a5   : > { %7142 = vst [vmem:[#allocation42_spill] sm:$0xff] %v6336_v48  ;;  %v2537_v25 = vsub.f32 %v6133_v18, %v6336_v48  ;;  %v2536_v31 = vsub.f32 %v6121_v29, %v6338_v55  ;;  %4579 = vpow2.f32 %v2573_v13 }
 0x2a6   : > { %4581 = vpow2.f32 %v2575_v23 }
 0x2a7   : > { %v2577_v4 = vmul.f32 1.442695, %v2536_v31  ;;  %v4572_v63 = vpop.eup %4571  ;;  %v2579_v19 = vmul.f32 1.442695, %v2537_v25 }
 0x2a8   : > { %v6344_v49 = vpop.xlane.xlu1 %2487  ;;  %v6346_v51 = vpop.xlane.xlu0 %2485  ;;  %2627 = vadd.xlane.f32.xlu1 %v4572_v63 }
 0x2a9   : > { %7143 = vst [vmem:[#allocation43_spill] sm:$0xff] %v6344_v49  ;;  %v2539_v10 = vsub.f32 %v6143_v57, %v6344_v49  ;;  %v2538_v40 = vsub.f32 %v6131_v9, %v6346_v51  ;;  %4583 = vpow2.f32 %v2577_v4  ;;  %v4574_v60 = vpop.eup %4573 }
 0x2aa   : > { %4585 = vpow2.f32 %v2579_v19 }
 0x2ab   : > { %v2581_v18 = vmul.f32 1.442695, %v2538_v40  ;;  %v4576_v48 = vpop.eup %4575  ;;  %v2583_v29 = vmul.f32 1.442695, %v2539_v10 }
 0x2ac   : > { %v6352_v13 = vpop.xlane.xlu1 %2491  ;;  %v6354_v31 = vpop.xlane.xlu0 %2489  ;;  %2631 = vadd.xlane.f32.xlu1 %v4574_v60  ;;  %2633 = vadd.xlane.f32.xlu0 %v4576_v48 }
 0x2ad   : > { %7144 = vst [vmem:[#allocation44_spill] sm:$0xff] %v6352_v13  ;;  %v2541_v23 = vsub.f32 %v6153_v15, %v6352_v13  ;;  %v2540_v63 = vsub.f32 %v6141_v30, %v6354_v31  ;;  %4587 = vpow2.f32 %v2581_v18  ;;  %v4578_v25 = vpop.eup %4577 }
 0x2ae   : > { %4589 = vpow2.f32 %v2583_v29 }
 0x2af   : > { %v2585_v4 = vmul.f32 1.442695, %v2540_v63  ;;  %v4580_v57 = vpop.eup %4579  ;;  %v2587_v9 = vmul.f32 1.442695, %v2541_v23 }
 0x2b0   : > { %v6360_v40 = vpop.xlane.xlu1 %2495  ;;  %v6362_v49 = vpop.xlane.xlu0 %2493  ;;  %2635 = vadd.xlane.f32.xlu1 %v4578_v25  ;;  %2637 = vadd.xlane.f32.xlu0 %v4580_v57 }
 0x2b1   : > { %7145 = vst [vmem:[#allocation45_spill] sm:$0xff] %v6360_v40  ;;  %v2543_v19 = vsub.f32 %v6165_v52, %v6360_v40  ;;  %v2542_v48 = vsub.f32 %v6151_v6, %v6362_v49  ;;  %4591 = vpow2.f32 %v2585_v4  ;;  %v4582_v10 = vpop.eup %4581 }
 0x2b2   : > { %4593 = vpow2.f32 %v2587_v9 }
 0x2b3   : > { %v2589_v18 = vmul.f32 1.442695, %v2542_v48  ;;  %v4584_v60 = vpop.eup %4583  ;;  %v2591_v13 = vmul.f32 1.442695, %v2543_v19 }
 0x2b4   : > { %v6368_v63 = vpop.xlane.xlu1 %2499  ;;  %v6370_v15 = vpop.xlane.xlu0 %2497  ;;  %2639 = vadd.xlane.f32.xlu1 %v4582_v10  ;;  %2641 = vadd.xlane.f32.xlu0 %v4584_v60 }
 0x2b5   : > { %7146 = vst [vmem:[#allocation46_spill] sm:$0xff] %v6368_v63  ;;  %v2545_v29 = vsub.f32 %v6175_v20, %v6368_v63  ;;  %v2544_v57 = vsub.f32 %v6163_v45, %v6370_v15  ;;  %4595 = vpow2.f32 %v2589_v18  ;;  %v4586_v23 = vpop.eup %4585 }
 0x2b6   : > { %4597 = vpow2.f32 %v2591_v13 }
 0x2b7   : > { %v2593_v25 = vmul.f32 1.442695, %v2544_v57  ;;  %v4588_v4 = vpop.eup %4587  ;;  %v2595_v40 = vmul.f32 1.442695, %v2545_v29 }
 0x2b8   : > { %v6376_v48 = vpop.xlane.xlu1 %2503  ;;  %v6378_v52 = vpop.xlane.xlu0 %2501  ;;  %2643 = vadd.xlane.f32.xlu1 %v4586_v23  ;;  %2645 = vadd.xlane.f32.xlu0 %v4588_v4 }
 0x2b9   : > { %7147 = vst [vmem:[#allocation47_spill] sm:$0xff] %v6376_v48  ;;  %v2547_v9 = vsub.f32 %v6187_v16, %v6376_v48  ;;  %v2546_v19 = vsub.f32 %v6173_v28, %v6378_v52  ;;  %4599 = vpow2.f32 %v2593_v25  ;;  %v4590_v10 = vpop.eup %4589 }
 0x2ba   : > { %4601 = vpow2.f32 %v2595_v40 }
 0x2bb   : > { %v2597_v18 = vmul.f32 1.442695, %v2546_v19  ;;  %v4592_v60 = vpop.eup %4591  ;;  %v2599_v63 = vmul.f32 1.442695, %v2547_v9 }
 0x2bc   : > { %v6384_v57 = vpop.xlane.xlu1 %2507  ;;  %v6386_v20 = vpop.xlane.xlu0 %2505  ;;  %2647 = vadd.xlane.f32.xlu1 %v4590_v10  ;;  %2649 = vadd.xlane.f32.xlu0 %v4592_v60 }
 0x2bd   : > { %7148 = vst [vmem:[#allocation48_spill] sm:$0xff] %v6384_v57  ;;  %v2549_v13 = vsub.f32 %v6197_v43, %v6384_v57  ;;  %v2548_v29 = vsub.f32 %v6185_v61, %v6386_v20  ;;  %4603 = vpow2.f32 %v2597_v18  ;;  %v4594_v23 = vpop.eup %4593 }
 0x2be   : > { %4605 = vpow2.f32 %v2599_v63 }
 0x2bf   : > { %v2601_v25 = vmul.f32 1.442695, %v2548_v29  ;;  %v4596_v4 = vpop.eup %4595  ;;  %v2603_v48 = vmul.f32 1.442695, %v2549_v13 }
 0x2c0   : > { %v6392_v19 = vpop.xlane.xlu1 %2511  ;;  %v6394_v16 = vpop.xlane.xlu0 %2509  ;;  %2651 = vadd.xlane.f32.xlu1 %v4594_v23  ;;  %2653 = vadd.xlane.f32.xlu0 %v4596_v4 }
 0x2c1   : > { %7149 = vst [vmem:[#allocation49_spill] sm:$0xff] %v6392_v19  ;;  %v2551_v40 = vsub.f32 %v6209_v36, %v6392_v19  ;;  %v2550_v9 = vsub.f32 %v6195_v26, %v6394_v16  ;;  %4607 = vpow2.f32 %v2601_v25  ;;  %v4598_v10 = vpop.eup %4597 }
 0x2c2   : > { %4609 = vpow2.f32 %v2603_v48 }
 0x2c3   : > { %v2605_v18 = vmul.f32 1.442695, %v2550_v9  ;;  %v4600_v60 = vpop.eup %4599  ;;  %v2607_v57 = vmul.f32 1.442695, %v2551_v40 }
 0x2c4   : > { %v6400_v29 = vpop.xlane.xlu1 %2515  ;;  %v6402_v43 = vpop.xlane.xlu0 %2513  ;;  %2655 = vadd.xlane.f32.xlu1 %v4598_v10  ;;  %2657 = vadd.xlane.f32.xlu0 %v4600_v60 }
 0x2c5   : > { %7150 = vst [vmem:[#allocation50_spill] sm:$0xff] %v6400_v29  ;;  %7151 = vst [vmem:[#allocation51_spill] sm:$0xff] %v6402_v43  ;;  %v2553_v63 = vsub.f32 %v6219_v2, %v6400_v29  ;;  %v2552_v13 = vsub.f32 %v6207_v62, %v6402_v43  ;;  %4611 = vpow2.f32 %v2605_v18  ;;  %v4602_v23 = vpop.eup %4601 }
 0x2c6   : > { %4613 = vpow2.f32 %v2607_v57 }
 0x2c7   : > { %v2609_v25 = vmul.f32 1.442695, %v2552_v13  ;;  %v4604_v4 = vpop.eup %4603  ;;  %v2611_v19 = vmul.f32 1.442695, %v2553_v63 }
 0x2c8   : > { %v6408_v9 = vpop.xlane.xlu1 %2519  ;;  %v6410_v36 = vpop.xlane.xlu0 %2517  ;;  %2659 = vadd.xlane.f32.xlu1 %v4602_v23  ;;  %2661 = vadd.xlane.f32.xlu0 %v4604_v4 }
 0x2c9   : > { %7152 = vst [vmem:[#allocation52_spill] sm:$0xff] %v6408_v9  ;;  %7153 = vst [vmem:[#allocation53_spill] sm:$0xff] %v6410_v36  ;;  %v2555_v48 = vsub.f32 %v6231_v7, %v6408_v9  ;;  %v2554_v40 = vsub.f32 %v6217_v59, %v6410_v36  ;;  %4615 = vpow2.f32 %v2609_v25  ;;  %v4606_v10 = vpop.eup %4605 }
 0x2ca   : > { %4617 = vpow2.f32 %v2611_v19 }
 0x2cb   : > { %v2613_v18 = vmul.f32 1.442695, %v2554_v40  ;;  %v4608_v60 = vpop.eup %4607  ;;  %v2615_v29 = vmul.f32 1.442695, %v2555_v48 }
 0x2cc   : > { %v6416_v13 = vpop.xlane.xlu1 %2523  ;;  %v6418_v2 = vpop.xlane.xlu0 %2521  ;;  %2663 = vadd.xlane.f32.xlu1 %v4606_v10  ;;  %2665 = vadd.xlane.f32.xlu0 %v4608_v60 }
 0x2cd   : > { %7154 = vst [vmem:[#allocation54_spill] sm:$0xff] %v6416_v13  ;;  %7155 = vst [vmem:[#allocation55_spill] sm:$0xff] %v6418_v2  ;;  %v2556_v57 = vsub.f32 %v6229_v27, %v6418_v2  ;;  %4619 = vpow2.f32 %v2613_v18  ;;  %v2557_v63 = vsub.f32 %v6243_v0, %v6416_v13  ;;  %v4610_v23 = vpop.eup %4609 }
 0x2ce   : > { %4621 = vpow2.f32 %v2615_v29 }
 0x2cf   : > { %v2617_v25 = vmul.f32 1.442695, %v2556_v57  ;;  %v4612_v4 = vpop.eup %4611  ;;  %v2619_v48 = vmul.f32 1.442695, %v2557_v63 }
 0x2d0   : > { %v6424_v40 = vpop.xlane.xlu0 %2525  ;;  %2667 = vadd.xlane.f32.xlu1 %v4610_v23  ;;  %2669 = vadd.xlane.f32.xlu0 %v4612_v4  ;;  %v4614_v10 = vpop.eup %4613  ;;  %v2462_v4 = vld [vmem:[%s4896_s27 + $0xf8] sm:$0xff] }
 0x2d1   : > { %7156 = vst [vmem:[#allocation56_spill] sm:$0xff] %v6424_v40  ;;  %v2558_v19 = vsub.f32 %v6239_v8, %v6424_v40  ;;  %4623 = vpow2.f32 %v2617_v25 }
 0x2d3   : > { %v2621_v60 = vmul.f32 1.442695, %v2558_v19  ;;  %v4616_v27 = vpop.eup %4615 }
 0x2d4   : > { %2671 = vadd.xlane.f32.xlu1 %v4614_v10  ;;  %2673 = vadd.xlane.f32.xlu0 %v4616_v27  ;;  %v4618_v18 = vpop.eup %4617  ;;  %v2461_v27 = vld [vmem:[%s4896_s27 + $0xf0] sm:$0xff]  ;;  %s4761_s27 = smov [#allocation2]  }
 0x2d5   : > { %4625 = vpow2.f32 %v2621_v60  ;;  %s4697_s9 = sshll.u32 %s4761_s27, 4  ;;  %s4698_s9 = int_to_ptr.vmem [resolvable:$false] %s4697_s9 }
 0x2d6   : > { %4627 = vpow2.f32 %v2619_v48  ;;  %s4699_s10 = scalar_lea.vmem %s4698_s9, 8192  ;;  %p4700_p0 = scmp.lt.s32.totalorder %s6437_s30, %s4698_s9 }
 0x2d7   : > { %v4620_v57 = vpop.eup %4619  ;;  %p4701_p1 = scmp.lt.s32.totalorder %s4699_s10, %s4693_s8 }
 0x2d8   : > { %2675 = vadd.xlane.f32.xlu1 %v4618_v18  ;;  %2677 = vadd.xlane.f32.xlu0 %v4620_v57  ;;  %v4622_v29 = vpop.eup %4621 }
 0x2d9   : > { %p4702_p2 = por %p4701_p1, %p4700_p0 }
 0x2db   : > { %v4624_v23 = vpop.eup %4623  ;;  %p4703_p3 = pnand %p4702_p2, %p4696_p13 }
 0x2dc   : > { %2679 = vadd.xlane.f32.xlu1 %v4622_v29  ;;  %2681 = vadd.xlane.f32.xlu0 %v4624_v23 }
 0x2df   : > { %v4626_v63 = vpop.eup %4625 }
 0x2e0   : > { %v4628_v25 = vpop.eup %4627  ;;  %2685 = vadd.xlane.f32.xlu0 %v4626_v63 }
 0x2e1   : > { %2683 = vadd.xlane.f32.xlu1 %v4628_v25 }
 0x2f2   : > { %2877 = vperm.xlu1 %4563, %v2462_v4  }
 0x2f6   : > { %2874 = vperm.xlu0 %4564, %v2461_v27  }
 0x2f7   : > { %4706 = shalt.err (!%p4703_p3)
}
 0x2f8   : > { %s4707_s11 = scalar_lea.hbm %s6435_s6, 4096  ;;  %s4711_s20 = scalar_lea.hbm %s6878_s2, 8192 }
 0x2f9   : > { %p4708_p4 = scmp.ne.s32.totalorder %s6435_s6, %s4707_s11  ;;  %p4712_p9 = scmp.lt.u32.totalorder %s6435_s6, %s6878_s2 }
 0x2fa   : > { %p4713_p10 = scmp.lt.u32.totalorder %s4711_s20, %s4707_s11  ;;  %p4715_p12 = scmp.lt.u32.totalorder %s4707_s11, %s6435_s6 }
 0x2fb   : > { %p4709_p7 = pnand %p4708_p4, %p4822_p5 }
 0x2fc   : > { %p4714_p11 = por %p4713_p10, %p4712_p9 }
 0x2fd   : > { %p4710_p8 = pneg %p4709_p7 }
 0x2fe   : > { %p4716_p13 = por %p4715_p12, %p4714_p11 }
 0x300   : > { %p4717_p0 = pnand %p4716_p13, %p4710_p8 }
 0x302   : > { %4720 = shalt.err (!%p4717_p0)
}
 0x303   : > { %s4762_s24 = smov 128   ;;  %s4763_s28 = smov 8   ;;  %v6465_v19 = vpop.permute.xlu0 %2868  ;;  %v6467_v48 = vpop.permute.xlu1 %2871  ;;  %v7159_v18 = vlaneseq  ;;  %vm2879_vm6 = vcmp.eq.s32.totalorder %v6155_v3, %v5183_v47  ;;  %vm2881_vm7 = vcmp.eq.s32.totalorder %v6177_v32, %v5183_v47  ;;  %vm2882_vm9 = vcmp.eq.s32.totalorder %v6199_v44, %v5183_v47 }
 0x304   : > { %4516 = dma.vmem_to_hbm [thread:$0]  (%p4822_p5), %s6437_s30, 4096, %s6435_s6, %s6441_s7, %s4762_s24, %s4762_s24, %s4763_s28   ;;  %7157 = vst [vmem:[#allocation57_spill] sm:$0xff] %v6465_v19  ;;  %7158 = vst [vmem:[#allocation58_spill] sm:$0xff] %v6467_v48  ;;  %vm2880_vm13 = vcmp.eq.s32.totalorder %v6261_v34, %v5183_v47  ;;  %vm2883_vm11 = vcmp.eq.s32.totalorder %v6221_v21, %v5183_v47  ;;  %vm2884_vm2 = vcmp.eq.s32.totalorder %v6241_v38, %v5183_v47  ;;  %v7160_v38 = vld [vmem:[#allocation34_spill] sm:$0xff] }
 0x305   : > { %v6470_v57 = vshrl.u32 %v7159_v18, 7  ;;  %s3389_s29 = sshll.u32 %s4805_s16, 8  ;;  %vm2885_vm5 = vcmp.eq.s32.totalorder %v6251_v46, %v5183_v47  ;;  %v7162_v46 = vld [vmem:[#allocation22_spill] sm:$0xff]  ;;  %p179_p5 = scmp.lt.s32.totalorder %s4805_s16, 1 }
 0x306   : > { %v6473_v23 = vstv %s3389_s29 }
 0x307   : > { %v2914_v63 = vadd.s32 16, %v6470_v57  ;;  %v2915_v25 = vadd.s32 24, %v6470_v57  ;;  %v2946_v8 = vadd.s32 %v6473_v23, %v6470_v57  ;;  %v2918_v13 = vadd.s32 48, %v6470_v57  ;;  %s7221_s16 = smov (!%p179_p5, %s4805_s16), 1 }
 0x308   : > { %v2919_v7 = vadd.s32 56, %v6470_v57  ;;  %v2920_v2 = vadd.s32 64, %v6470_v57  ;;  %v2933_v3 = vadd.s32 168, %v6470_v57  ;;  %v2937_v32 = vadd.s32 200, %v6470_v57  ;;  %s3260_s22 = sshll.u32 %s7221_s16, 3 }
 0x309   : > { %v6482_v0 = vadd.s32 %v6473_v23, %v2914_v63  ;;  %v6489_v9 = vadd.s32 %v6473_v23, %v2915_v25  ;;  %vm2978_vm14 = vcmp.lt.s32.totalorder %v2946_v8, 320  ;;  %v6502_v25 = vadd.s32 %v6473_v23, %v2918_v13  ;;  %s182_s5 = scalar_lea.vmem %s6879_s3, %s3260_s22 }
 0x30a   : > { %v2923_v13 = vadd.s32 88, %v6470_v57  ;;  %vm3010_vm0 = vmand %vm2879_vm6, %vm2978_vm14  ;;  %vm2886_vm6 = vcmp.eq.s32.totalorder %v6254_v17, %v5183_v47  ;;  %v6612_v21 = vadd.s32 %v6473_v23, %v2937_v32 }
 0x30b   : > { %vm2980_vm15 = vcmp.lt.s32.totalorder %v6482_v0, 320  ;;  %vm2981_vm8 = vcmp.lt.s32.totalorder %v6489_v9, 320  ;;  %vm2984_vm4 = vcmp.lt.s32.totalorder %v6502_v25, 320 }
 0x30c   : > { %v6542_v8 = vadd.s32 %v6473_v23, %v2923_v13 }
 0x32c   : > { %v2626_v10 = vpop.xlane.xlu0 %2625 }
 0x32d   : > { %4629 = vlog2.f32 %v2626_v10  ;;  %v2624_v60 = vpop.xlane.xlu1 %2623  ;;  %v2916_v10 = vadd.s32 32, %v6470_v57 }
 0x32e   : > { %4631 = vlog2.f32 %v2624_v60  ;;  %v2917_v60 = vadd.s32 40, %v6470_v57 }
 0x330   : > { %v6495_v63 = vadd.s32 %v6473_v23, %v2917_v60  ;;  %v6508_v60 = vadd.s32 %v6473_v23, %v2920_v2 }
 0x331   : > { %v2630_v29 = vpop.xlane.xlu0 %2629 }
 0x332   : > { %4633 = vlog2.f32 %v2630_v29  ;;  %v2913_v29 = vadd.s32 8, %v6470_v57  ;;  %vm2983_vm1 = vcmp.lt.s32.totalorder %v6495_v63, 320 }
 0x334   : > { %v2947_v36 = vadd.s32 %v6473_v23, %v2913_v29  ;;  %v2927_v29 = vadd.s32 120, %v6470_v57 }
 0x335   : > { %v2628_v4 = vpop.xlane.xlu1 %2627 }
 0x336   : > { %4635 = vlog2.f32 %v2628_v4  ;;  %v6492_v4 = vadd.s32 %v6473_v23, %v2916_v10  ;;  %v6505_v10 = vadd.s32 %v6473_v23, %v2919_v7  ;;  %v2921_v7 = vadd.s32 72, %v6470_v57 }
 0x337   : > { %v4630_v27 = vpop.eup %4629  ;;  %vm2979_vm12 = vcmp.lt.s32.totalorder %v2947_v36, 320  ;;  %v6557_v36 = vadd.s32 %v6473_v23, %v2927_v29 }
 0x338   : > { %v4632_v18 = vpop.eup %4631  ;;  %v2690_v40 = vmul.f32 0.6931472, %v4630_v27  ;;  %vm2982_vm10 = vcmp.lt.s32.totalorder %v6492_v4, 320  ;;  %vm3011_vm3 = vmand %vm2880_vm13, %vm2979_vm12  ;;  %vm2985_vm14 = vcmp.lt.s32.totalorder %v6505_v10, 320  ;;  %vm2986_vm12 = vcmp.lt.s32.totalorder %v6508_v60, 320 }
 0x339   : > { %v2688_v48 = vmul.f32 0.6931472, %v4632_v18  ;;  %v2632_v19 = vpop.xlane.xlu1 %2631  ;;  %v2634_v59 = vpop.xlane.xlu0 %2633  ;;  %vm3012_vm13 = vmand %vm2881_vm7, %vm2980_vm15 }
 0x33a   : > { %4637 = vlog2.f32 %v2632_v19  ;;  %v2752_v62 = vadd.f32 %v2690_v40, %v6300_v41  ;;  %vm3013_vm15 = vmand %vm2882_vm9, %vm2981_vm8 }
 0x33b   : > { %v2751_v18 = vadd.f32 %v2688_v48, %v6304_v11  ;;  %4639 = vlog2.f32 %v2634_v59  ;;  %v2925_v48 = vadd.s32 104, %v6470_v57  ;;  %vm3014_vm8 = vmand %vm2883_vm11, %vm2982_vm10  ;;  %vm2989_vm10 = vcmp.lt.s32.totalorder %v6542_v8, 320 }
 0x33c   : > { %v4634_v27 = vpop.eup %4633  ;;  %v3043_v2 = vsub.f32 %v2752_v62, %v6080_v54  ;;  %v2931_v54 = vadd.s32 152, %v6470_v57  ;;  %vm3015_vm9 = vmand %vm2884_vm2, %vm2983_vm1  ;;  %vm2890_vm11 = vcmp.eq.s32.totalorder %v6264_v39, %v5183_v47 }
 0x33d   : > { %v2694_v59 = vmul.f32 0.6931472, %v4634_v27  ;;  %v2636_v41 = vpop.xlane.xlu1 %2635  ;;  %v2638_v11 = vpop.xlane.xlu0 %2637  ;;  %v3042_v40 = vsub.f32 %v2751_v18, %v6082_v14  ;;  %v2929_v27 = vadd.s32 136, %v6470_v57  ;;  %v6554_v13 = vadd.s32 %v6473_v23, %v2925_v48  ;;  %vm3016_vm1 = vmand %vm2885_vm5, %vm2984_vm4 }
 0x33e   : > { %4641 = vlog2.f32 %v2636_v41  ;;  %vm3017_vm2 = vmand %vm2886_vm6, %vm2985_vm14  ;;  %vm2889_vm4 = vcmp.eq.s32.totalorder %v7162_v46, %v5183_v47 }
 0x33f   : > { %4643 = vlog2.f32 %v2638_v11  ;;  %v2754_v14 = vadd.f32 %v2694_v59, %v6308_v35  ;;  %v6539_v11 = vadd.s32 %v6473_v23, %v2921_v7  ;;  %v3075_v35 = vsel %vm3011_vm3, %v3043_v2, 0.0 }
 0x340   : > { %v4636_v19 = vpop.eup %4635  ;;  %v3074_v59 = vsel %vm3010_vm0, %v3042_v40, 0.0  ;;  %v6560_v34 = vadd.s32 %v6473_v23, %v2929_v27  ;;  %v6576_v27 = vadd.s32 %v6473_v23, %v2933_v3  ;;  %vm2887_vm0 = vcmp.eq.s32.totalorder %v6257_v1, %v5183_v47  ;;  %v7167_v1 = vld [vmem:[#allocation24_spill] sm:$0xff] }
 0x341   : > { %v2692_v62 = vmul.f32 0.6931472, %v4636_v19  ;;  %v2640_v18 = vpop.xlane.xlu1 %2639  ;;  %v2642_v41 = vpop.xlane.xlu0 %2641  ;;  %v3045_v2 = vsub.f32 %v2754_v14, %v6092_v22  ;;  %v2935_v22 = vadd.s32 184, %v6470_v57  ;;  %v2939_v14 = vadd.s32 216, %v6470_v57  ;;  %vm3018_vm14 = vmand %vm2887_vm0, %vm2986_vm12 }
 0x342   : > { %4645 = vlog2.f32 %v2640_v18  ;;  %vm2987_vm7 = vcmp.lt.s32.totalorder %v6539_v11, 320  ;;  %vm2888_vm3 = vcmp.eq.s32.totalorder %v6259_v42, %v5183_v47  ;;  %vm2991_vm5 = vcmp.lt.s32.totalorder %v6554_v13, 320 }
 0x343   : > { %v2753_v19 = vadd.f32 %v2692_v62, %v6314_v5  ;;  %4647 = vlog2.f32 %v2642_v41  ;;  %v6566_v5 = vadd.s32 %v6473_v23, %v2931_v54  ;;  %v3106_v41 = vadd.f32 %v3075_v35, %v3074_v59  ;;  %vm3019_vm6 = vmand %vm2888_vm3, %vm2987_vm7 }
 0x344   : > { %v4638_v7 = vpop.eup %4637  ;;  %v3077_v9 = vsel %vm3013_vm15, %v3045_v2, 0.0  ;;  %vm2891_vm12 = vcmp.eq.s32.totalorder %v7167_v1, %v5183_v47  ;;  %vm2993_vm0 = vcmp.lt.s32.totalorder %v6557_v36, 320  ;;  %v2928_v11 = vadd.s32 128, %v6470_v57 }
 0x345   : > { %v4640_v18 = vpop.eup %4639  ;;  %v3044_v40 = vsub.f32 %v2753_v19, %v6094_v33  ;;  %v2696_v48 = vmul.f32 0.6931472, %v4638_v7  ;;  %v2644_v62 = vpop.xlane.xlu1 %2643  ;;  %v2934_v36 = vadd.s32 176, %v6470_v57 }
 0x346   : > { %v2646_v29 = vpop.xlane.xlu0 %2645  ;;  %v2698_v43 = vmul.f32 0.6931472, %v4640_v18  ;;  %4649 = vlog2.f32 %v2644_v62 }
 0x347   : > { %v3076_v33 = vsel %vm3012_vm13, %v3044_v40, 0.0  ;;  %v2755_v0 = vadd.f32 %v2696_v48, %v6312_v53  ;;  %4651 = vlog2.f32 %v2646_v29  ;;  %v2922_v53 = vadd.s32 80, %v6470_v57 }
 0x348   : > { %v4642_v54 = vpop.eup %4641  ;;  %v3107_v3 = vadd.f32 %v3106_v41, %v3076_v33  ;;  %v2756_v35 = vadd.f32 %v2698_v43, %v6322_v37  ;;  %v6603_v48 = vadd.s32 %v6473_v23, %v2935_v22 }
 0x349   : > { %v4644_v59 = vpop.eup %4643  ;;  %v3046_v19 = vsub.f32 %v2755_v0, %v6103_v50  ;;  %v2700_v44 = vmul.f32 0.6931472, %v4642_v54  ;;  %v2648_v7 = vpop.xlane.xlu1 %2647 }
 0x34a   : > { %v2650_v18 = vpop.xlane.xlu0 %2649  ;;  %v3108_v43 = vadd.f32 %v3107_v3, %v3077_v9  ;;  %v3047_v37 = vsub.f32 %v2756_v35, %v6101_v58  ;;  %v2702_v40 = vmul.f32 0.6931472, %v4644_v59  ;;  %4653 = vlog2.f32 %v2648_v7  ;;  %v7161_v59 = vld [vmem:[#allocation41_spill] sm:$0xff] }
 0x34b   : > { %v3078_v2 = vsel %vm3014_vm8, %v3046_v19, 0.0  ;;  %v2757_v50 = vadd.f32 %v2700_v44, %v6320_v24  ;;  %4655 = vlog2.f32 %v2650_v18  ;;  %v6615_v58 = vadd.s32 %v6473_v23, %v2939_v14  ;;  %v7163_v7 = vld [vmem:[#allocation21_spill] sm:$0xff]  ;;  %v7164_v18 = vld [vmem:[#allocation35_spill] sm:$0xff] }
 0x34c   : > { %v4646_v62 = vpop.eup %4645  ;;  %v3109_v4 = vadd.f32 %v3108_v43, %v3078_v2  ;;  %v2758_v29 = vadd.f32 %v2702_v40, %v6330_v12  ;;  %v2956_v24 = vadd.s32 %v6473_v23, %v2922_v53  ;;  %v3079_v63 = vsel %vm3015_vm9, %v3047_v37, 0.0  ;;  %v7165_v2 = vld [vmem:[#allocation33_spill] sm:$0xff]  ;;  %vm3021_vm9 = vmand %vm2890_vm11, %vm2989_vm10 }
 0x34d   : > { %v4648_v41 = vpop.eup %4647  ;;  %v3048_v22 = vsub.f32 %v2757_v50, %v7160_v38  ;;  %v2704_v33 = vmul.f32 0.6931472, %v4646_v62  ;;  %v2652_v0 = vpop.xlane.xlu1 %2651  ;;  %v2924_v3 = vadd.s32 96, %v6470_v57  ;;  %vm2892_vm13 = vcmp.eq.s32.totalorder %v7163_v7, %v5183_v47 }
 0x34e   : > { %v2654_v54 = vpop.xlane.xlu0 %2653  ;;  %v3110_v12 = vadd.f32 %v3109_v4, %v3079_v63  ;;  %v3049_v32 = vsub.f32 %v2758_v29, %v6111_v56  ;;  %v2706_v14 = vmul.f32 0.6931472, %v4648_v41  ;;  %4657 = vlog2.f32 %v2652_v0  ;;  %v7166_v41 = vld [vmem:[#allocation42_spill] sm:$0xff]  ;;  %vm3023_vm11 = vmand %vm2892_vm13, %vm2991_vm5 }
 0x34f   : > { %v3080_v35 = vsel %vm3016_vm1, %v3048_v22, 0.0  ;;  %v2759_v53 = vadd.f32 %v2704_v33, %v7161_v59  ;;  %4659 = vlog2.f32 %v2654_v54  ;;  %v2926_v56 = vadd.s32 112, %v6470_v57  ;;  %v7168_v54 = vld [vmem:[#allocation23_spill] sm:$0xff]  ;;  %v7170_v59 = vld [vmem:[#allocation6_spill] sm:$0xff] }
 0x350   : > { %v4650_v9 = vpop.eup %4649  ;;  %v3111_v25 = vadd.f32 %v3110_v12, %v3080_v35  ;;  %v2760_v19 = vadd.f32 %v2706_v14, %v6338_v55  ;;  %vm2988_vm15 = vcmp.lt.s32.totalorder %v2956_v24, 320  ;;  %v3081_v10 = vsel %vm3017_vm2, %v3049_v32, 0.0  ;;  %v7169_v32 = vld [vmem:[#allocation8_spill] sm:$0xff]  ;;  %v7172_v24 = vld [vmem:[#allocation26_spill] sm:$0xff] }
 0x351   : > { %v4652_v44 = vpop.eup %4651  ;;  %v3050_v43 = vsub.f32 %v2759_v53, %v7164_v18  ;;  %v2708_v17 = vmul.f32 0.6931472, %v4650_v9  ;;  %v2656_v37 = vpop.xlane.xlu1 %2655  ;;  %v2958_v4 = vadd.s32 %v6473_v23, %v2924_v3  ;;  %v2960_v60 = vadd.s32 %v6473_v23, %v2926_v56  ;;  %vm3020_vm7 = vmand %vm2889_vm4, %vm2988_vm15 }
 0x352   : > { %v2658_v40 = vpop.xlane.xlu0 %2657  ;;  %v3112_v55 = vadd.f32 %v3111_v25, %v3081_v10  ;;  %v3051_v50 = vsub.f32 %v2760_v19, %v7165_v2  ;;  %v2710_v62 = vmul.f32 0.6931472, %v4652_v44  ;;  %4661 = vlog2.f32 %v2656_v37  ;;  %v7171_v25 = vld [vmem:[#allocation43_spill] sm:$0xff]  ;;  %v7174_v37 = vld [vmem:[#allocation5_spill] sm:$0xff] }
 0x353   : > { %v3082_v29 = vsel %vm3018_vm14, %v3050_v43, 0.0  ;;  %v2761_v63 = vadd.f32 %v2708_v17, %v7166_v41  ;;  %4663 = vlog2.f32 %v2658_v40  ;;  %vm2894_vm8 = vcmp.eq.s32.totalorder %v7168_v54, %v5183_v47  ;;  %v7173_v43 = vld [vmem:[#allocation25_spill] sm:$0xff] }
 0x354   : > { %v4654_v38 = vpop.eup %4653  ;;  %v3113_v22 = vadd.f32 %v3112_v55, %v3082_v29  ;;  %v2762_v33 = vadd.f32 %v2710_v62, %v6346_v51  ;;  %v3083_v12 = vsel %vm3019_vm6, %v3051_v50, 0.0  ;;  %vm2990_vm3 = vcmp.lt.s32.totalorder %v2958_v4, 320  ;;  %v7176_v4 = vld [vmem:[#allocation28_spill] sm:$0xff]  ;;  %vm3025_vm13 = vmand %vm2894_vm8, %vm2993_vm0 }
 0x355   : > { %v4656_v0 = vpop.eup %4655  ;;  %v3052_v42 = vsub.f32 %v2761_v63, %v7169_v32  ;;  %v2712_v14 = vmul.f32 0.6931472, %v4654_v38  ;;  %v2660_v3 = vpop.xlane.xlu1 %2659  ;;  %vm2992_vm1 = vcmp.lt.s32.totalorder %v2960_v60, 320  ;;  %vm2893_vm2 = vcmp.eq.s32.totalorder %v7172_v24, %v5183_v47  ;;  %vm3022_vm10 = vmand %vm2891_vm12, %vm2990_vm3  ;;  %v7175_v63 = vld [vmem:[#allocation44_spill] sm:$0xff]  ;;  %v7180_v60 = vld [vmem:[#allocation30_spill] sm:$0xff] }
 0x356   : > { %v2662_v35 = vpop.xlane.xlu0 %2661  ;;  %v3114_v51 = vadd.f32 %v3113_v22, %v3083_v12  ;;  %v3053_v53 = vsub.f32 %v2762_v33, %v7170_v59  ;;  %v2714_v9 = vmul.f32 0.6931472, %v4656_v0  ;;  %4665 = vlog2.f32 %v2660_v3  ;;  %v7178_v12 = vld [vmem:[#allocation7_spill] sm:$0xff]  ;;  %vm3024_vm5 = vmand %vm2893_vm2, %vm2992_vm1  ;;  %v7181_v24 = vld [vmem:[#allocation29_spill] sm:$0xff] }
 0x357   : > { %v3084_v56 = vsel %vm3020_vm7, %v3052_v42, 0.0  ;;  %v2763_v19 = vadd.f32 %v2712_v14, %v7171_v25  ;;  %4667 = vlog2.f32 %v2662_v35  ;;  %vm2995_vm4 = vcmp.lt.s32.totalorder %v6560_v34, 320 }
 0x358   : > { %v4658_v44 = vpop.eup %4657  ;;  %v3115_v46 = vadd.f32 %v3114_v51, %v3084_v56  ;;  %v2764_v10 = vadd.f32 %v2714_v9, %v6354_v31  ;;  %vm2896_vm15 = vcmp.eq.s32.totalorder %v7173_v43, %v5183_v47  ;;  %v2962_v17 = vadd.s32 %v6473_v23, %v2928_v11  ;;  %v7177_v11 = vld [vmem:[#allocation27_spill] sm:$0xff] }
 0x359   : > { %v4660_v18 = vpop.eup %4659  ;;  %v3085_v8 = vsel %vm3021_vm9, %v3053_v53, 0.0  ;;  %v3054_v40 = vsub.f32 %v2763_v19, %v7174_v37  ;;  %v2716_v39 = vmul.f32 0.6931472, %v4658_v44  ;;  %v2664_v55 = vpop.xlane.xlu1 %2663  ;;  %v2930_v29 = vadd.s32 144, %v6470_v57  ;;  %v7179_v53 = vld [vmem:[#allocation45_spill] sm:$0xff]  ;;  %vm3027_vm2 = vmand %vm2896_vm15, %vm2995_vm4 }
 0x35a   : > { %v2666_v2 = vpop.xlane.xlu0 %2665  ;;  %v3116_v31 = vadd.f32 %v3115_v46, %v3085_v8  ;;  %v3055_v50 = vsub.f32 %v2764_v10, %v6141_v30  ;;  %v2718_v62 = vmul.f32 0.6931472, %v4660_v18  ;;  %4669 = vlog2.f32 %v2664_v55  ;;  %v7182_v10 = vld [vmem:[#allocation10_spill] sm:$0xff] }
 0x35b   : > { %v3086_v41 = vsel %vm3022_vm10, %v3054_v40, 0.0  ;;  %v2765_v38 = vadd.f32 %v2716_v39, %v7175_v63  ;;  %4671 = vlog2.f32 %v2666_v2  ;;  %vm2895_vm14 = vcmp.eq.s32.totalorder %v7176_v4, %v5183_v47  ;;  %v7183_v2 = vld [vmem:[#allocation46_spill] sm:$0xff] }
 0x35c   : > { %v4662_v22 = vpop.eup %4661  ;;  %v2932_v30 = vadd.s32 160, %v6470_v57  ;;  %v3117_v1 = vadd.f32 %v3116_v31, %v3086_v41  ;;  %v2766_v33 = vadd.f32 %v2718_v62, %v6362_v49  ;;  %vm2997_vm6 = vcmp.lt.s32.totalorder %v6566_v5, 320  ;;  %v7185_v41 = vld [vmem:[#allocation31_spill] sm:$0xff] }
 0x35d   : > { %v4664_v0 = vpop.eup %4663  ;;  %vm2898_vm12 = vcmp.eq.s32.totalorder %v7177_v11, %v5183_v47  ;;  %vm2994_vm7 = vcmp.lt.s32.totalorder %v2962_v17, 320  ;;  %v3087_v13 = vsel %vm3023_vm11, %v3055_v50, 0.0  ;;  %v3056_v32 = vsub.f32 %v2765_v38, %v7178_v12  ;;  %v2668_v42 = vpop.xlane.xlu1 %2667  ;;  %v7184_v17 = vld [vmem:[#allocation32_spill] sm:$0xff]  ;;  %v7186_v38 = vld [vmem:[#allocation9_spill] sm:$0xff]  ;;  %v7187_v12 = vld [vmem:[#allocation47_spill] sm:$0xff] }
 0x35e   : > { %v2720_v7 = vmul.f32 0.6931472, %v4662_v22  ;;  %v2670_v14 = vpop.xlane.xlu0 %2669  ;;  %v3118_v3 = vadd.f32 %v3117_v1, %v3087_v13  ;;  %v3057_v49 = vsub.f32 %v2766_v33, %v6151_v6  ;;  %v2722_v35 = vmul.f32 0.6931472, %v4664_v0  ;;  %vm3026_vm0 = vmand %vm2895_vm14, %vm2994_vm7 }
 0x35f   : > { %4673 = vlog2.f32 %v2668_v42  ;;  %v2964_v51 = vadd.s32 %v6473_v23, %v2930_v29  ;;  %v3088_v59 = vsel %vm3024_vm5, %v3056_v32, 0.0  ;;  %vm2897_vm3 = vcmp.eq.s32.totalorder %v7180_v60, %v5183_v47  ;;  %vm3029_vm15 = vmand %vm2898_vm12, %vm2997_vm6  ;;  %v7188_v42 = vld [vmem:[#allocation36_spill] sm:$0xff] }
 0x360   : > { %v2767_v9 = vadd.f32 %v2720_v7, %v7179_v53  ;;  %4675 = vlog2.f32 %v2670_v14  ;;  %v4666_v56 = vpop.eup %4665  ;;  %v2966_v6 = vadd.s32 %v6473_v23, %v2932_v30  ;;  %v3119_v25 = vadd.f32 %v3118_v3, %v3088_v59 }
 0x361   : > { %v2768_v19 = vadd.f32 %v2722_v35, %v6370_v15  ;;  %v4668_v44 = vpop.eup %4667  ;;  %vm2999_vm9 = vcmp.lt.s32.totalorder %v6576_v27, 320  ;;  %vm2900_vm1 = vcmp.eq.s32.totalorder %v7181_v24, %v5183_v47  ;;  %v3089_v46 = vsel %vm3025_vm13, %v3057_v49, 0.0  ;;  %v2672_v8 = vpop.xlane.xlu1 %2671 }
 0x362   : > { %v3058_v54 = vsub.f32 %v2767_v9, %v7182_v10  ;;  %v2724_v18 = vmul.f32 0.6931472, %v4666_v56  ;;  %v2674_v37 = vpop.xlane.xlu0 %2673  ;;  %v3120_v15 = vadd.f32 %v3119_v25, %v3089_v46  ;;  %v2726_v39 = vmul.f32 0.6931472, %v4668_v44  ;;  %vm3031_vm12 = vmand %vm2900_vm1, %vm2999_vm9 }
 0x363   : > { %v3059_v40 = vsub.f32 %v2768_v19, %v6163_v45  ;;  %4677 = vlog2.f32 %v2672_v8  ;;  %vm2996_vm8 = vcmp.lt.s32.totalorder %v2964_v51, 320  ;;  %vm2998_vm10 = vcmp.lt.s32.totalorder %v2966_v6, 320  ;;  %v7189_v51 = vld [vmem:[#allocation12_spill] sm:$0xff]  ;;  %v7191_v6 = vld [vmem:[#allocation38_spill] sm:$0xff] }
 0x364   : > { %v3090_v55 = vsel %vm3026_vm0, %v3058_v54, 0.0  ;;  %v2769_v31 = vadd.f32 %v2724_v18, %v7183_v2  ;;  %4679 = vlog2.f32 %v2674_v37  ;;  %v4670_v50 = vpop.eup %4669  ;;  %vm2899_vm11 = vcmp.eq.s32.totalorder %v7184_v17, %v5183_v47  ;;  %vm3028_vm4 = vmand %vm2897_vm3, %vm2996_vm8  ;;  %v7190_v19 = vld [vmem:[#allocation48_spill] sm:$0xff]  ;;  %v7192_v37 = vld [vmem:[#allocation11_spill] sm:$0xff] }
 0x365   : > { %v3121_v62 = vadd.f32 %v3120_v15, %v3090_v55  ;;  %v2770_v45 = vadd.f32 %v2726_v39, %v6378_v52  ;;  %v4672_v29 = vpop.eup %4671  ;;  %vm3001_vm14 = vcmp.lt.s32.totalorder %v6603_v48, 320  ;;  %vm2902_vm7 = vcmp.eq.s32.totalorder %v7185_v41, %v5183_v47  ;;  %v2676_v4 = vpop.xlane.xlu1 %2675  ;;  %vm3030_vm6 = vmand %vm2899_vm11, %vm2998_vm10 }
 0x366   : > { %v2968_v63 = vadd.s32 %v6473_v23, %v2934_v36  ;;  %v3091_v34 = vsel %vm3027_vm2, %v3059_v40, 0.0  ;;  %v3060_v22 = vsub.f32 %v2769_v31, %v7186_v38  ;;  %v2728_v43 = vmul.f32 0.6931472, %v4670_v50  ;;  %v2678_v30 = vpop.xlane.xlu0 %2677  ;;  %v7193_v31 = vld [vmem:[#allocation49_spill] sm:$0xff]  ;;  %vm3033_vm2 = vmand %vm2902_vm7, %vm3001_vm14 }
 0x367   : > { %v3122_v52 = vadd.f32 %v3121_v62, %v3091_v34  ;;  %v3061_v1 = vsub.f32 %v2770_v45, %v6173_v28  ;;  %v2730_v33 = vmul.f32 0.6931472, %v4672_v29  ;;  %4681 = vlog2.f32 %v2676_v4  ;;  %v7194_v62 = vld [vmem:[#allocation37_spill] sm:$0xff]  ;;  %v7195_v29 = vld [vmem:[#allocation51_spill] sm:$0xff] }
 0x368   : > { %v2936_v0 = vadd.s32 192, %v6470_v57  ;;  %v3092_v13 = vsel %vm3028_vm4, %v3060_v22, 0.0  ;;  %v2771_v32 = vadd.f32 %v2728_v43, %v7187_v12  ;;  %4683 = vlog2.f32 %v2678_v30  ;;  %v7196_v22 = vld [vmem:[#allocation13_spill] sm:$0xff]  ;;  %v7197_v30 = vld [vmem:[#allocation14_spill] sm:$0xff] }
 0x369   : > { %v4674_v7 = vpop.eup %4673  ;;  %vm2901_vm5 = vcmp.eq.s32.totalorder %v7188_v42, %v5183_v47  ;;  %v2938_v28 = vadd.s32 208, %v6470_v57  ;;  %v3123_v14 = vadd.f32 %v3122_v52, %v3092_v13  ;;  %v2772_v3 = vadd.f32 %v2730_v33, %v6386_v20  ;;  %v2680_v53 = vpop.xlane.xlu1 %2679  ;;  %v7198_v33 = vld [vmem:[#allocation40_spill] sm:$0xff]  ;;  %v7199_v13 = vld [vmem:[#allocation50_spill] sm:$0xff]  ;;  %v7200_v42 = vld [vmem:[#allocation39_spill] sm:$0xff] }
 0x36a   : > { %v4676_v49 = vpop.eup %4675  ;;  %vm3003_vm13 = vcmp.lt.s32.totalorder %v6612_v21, 320  ;;  %vm3000_vm3 = vcmp.lt.s32.totalorder %v2968_v63, 320  ;;  %v3093_v35 = vsel %vm3029_vm15, %v3061_v1, 0.0  ;;  %v3062_v59 = vsub.f32 %v2771_v32, %v7189_v51  ;;  %v2682_v9 = vpop.xlane.xlu0 %2681 }
 0x36b   : > { %v2732_v5 = vmul.f32 0.6931472, %v4674_v7  ;;  %v3124_v11 = vadd.f32 %v3123_v14, %v3093_v35  ;;  %v3063_v56 = vsub.f32 %v2772_v3, %v6185_v61  ;;  %v2734_v60 = vmul.f32 0.6931472, %v4676_v49  ;;  %vm3032_vm9 = vmand %vm2901_vm5, %vm3000_vm3  ;;  %v7201_v3 = vld [vmem:[#allocation53_spill] sm:$0xff] }
 0x36c   : > { %4685 = vlog2.f32 %v2680_v53  ;;  %v2970_v20 = vadd.s32 %v6473_v23, %v2936_v0  ;;  %v3094_v25 = vsel %vm3030_vm6, %v3062_v59, 0.0  ;;  %vm2903_vm0 = vcmp.eq.s32.totalorder %v7191_v6, %v5183_v47  ;;  %v7202_v59 = vld [vmem:[#allocation15_spill] sm:$0xff] }
 0x36d   : > { %v2773_v44 = vadd.f32 %v2732_v5, %v7190_v19  ;;  %4687 = vlog2.f32 %v2682_v9  ;;  %v4678_v36 = vpop.eup %4677  ;;  %v2972_v61 = vadd.s32 %v6473_v23, %v2938_v28  ;;  %v3125_v46 = vadd.f32 %v3124_v11, %v3094_v25  ;;  %v7203_v11 = vld [vmem:[#allocation16_spill] sm:$0xff] }
 0x36e   : > { %v2774_v10 = vadd.f32 %v2734_v60, %v6394_v16  ;;  %v4680_v54 = vpop.eup %4679  ;;  %vm3005_vm8 = vcmp.lt.s32.totalorder %v6615_v58, 320  ;;  %v2940_v18 = vadd.s32 224, %v6470_v57  ;;  %v3095_v8 = vsel %vm3031_vm12, %v3063_v56, 0.0  ;;  %v2684_v40 = vpop.xlane.xlu1 %2683  ;;  %v7205_v19 = vld [vmem:[#allocation52_spill] sm:$0xff]  ;;  %v7209_v58 = vld [vmem:[#allocation18_spill] sm:$0xff] }
 0x36f   : > { %v3064_v27 = vsub.f32 %v2773_v44, %v7192_v37  ;;  %v2736_v15 = vmul.f32 0.6931472, %v4678_v36  ;;  %v2686_v24 = vpop.xlane.xlu0 %2685  ;;  %v3126_v39 = vadd.f32 %v3125_v46, %v3095_v8  ;;  %v2738_v16 = vmul.f32 0.6931472, %v4680_v54 }
 0x370   : > { %v3065_v55 = vsub.f32 %v2774_v10, %v6195_v26  ;;  %4689 = vlog2.f32 %v2684_v40  ;;  %vm3002_vm1 = vcmp.lt.s32.totalorder %v2970_v20, 320  ;;  %vm2904_vm10 = vcmp.eq.s32.totalorder %v7194_v62, %v5183_v47  ;;  %v7204_v20 = vld [vmem:[#allocation57_spill] sm:$0xff]  ;;  %v7207_v10 = vld [vmem:[#allocation55_spill] sm:$0xff] }
 0x371   : > { %v3096_v2 = vsel %vm3032_vm9, %v3064_v27, 0.0  ;;  %v2775_v50 = vadd.f32 %v2736_v15, %v7193_v31  ;;  %4691 = vlog2.f32 %v2686_v24  ;;  %v4682_v17 = vpop.eup %4681  ;;  %v2941_v45 = vadd.s32 232, %v6470_v57  ;;  %vm3034_vm4 = vmand %vm2903_vm0, %vm3002_vm1  ;;  %v7208_v27 = vld [vmem:[#allocation17_spill] sm:$0xff]  ;;  %v7210_v31 = vld [vmem:[#allocation54_spill] sm:$0xff] }
 0x372   : > { %v3127_v26 = vadd.f32 %v3126_v39, %v3096_v2  ;;  %v2776_v63 = vadd.f32 %v2738_v16, %v7195_v29  ;;  %v4684_v34 = vpop.eup %4683  ;;  %vm3004_vm11 = vcmp.lt.s32.totalorder %v2972_v61, 320  ;;  %v3097_v38 = vsel %vm3033_vm2, %v3065_v55, 0.0  ;;  %vm3035_vm7 = vmand %vm2904_vm10, %vm3003_vm13  ;;  %v7206_v61 = vld [vmem:[#allocation58_spill] sm:$0xff]  ;;  %v2878_v16 = vpop.permute.xlu1 %2877 }
 0x373   : > { %v3066_v43 = vsub.f32 %v2775_v50, %v7196_v22  ;;  %v2740_v4 = vmul.f32 0.6931472, %v4682_v17  ;;  %v2974_v48 = vadd.s32 %v6473_v23, %v2940_v18  ;;  %v2742_v1 = vmul.f32 0.6931472, %v4684_v34  ;;  %v7213_v34 = vld [vmem:[#allocation20_spill] sm:$0xff] }
 0x374   : > { %v3128_v41 = vadd.f32 %v3127_v26, %v3097_v38  ;;  %v3067_v52 = vsub.f32 %v2776_v63, %v7197_v30  ;;  %vm2905_vm14 = vcmp.eq.s32.totalorder %v7198_v33, %v5183_v47  ;;  %v2942_v32 = vadd.s32 240, %v6470_v57  ;;  %v7212_v26 = vld [vmem:[#allocation19_spill] sm:$0xff] }
 0x375   : > { %v3098_v0 = vsel %vm3034_vm4, %v3066_v43, 0.0  ;;  %v2777_v12 = vadd.f32 %v2740_v4, %v7199_v13  ;;  %vm2906_vm15 = vcmp.eq.s32.totalorder %v7200_v42, %v5183_v47  ;;  %v2975_v28 = vadd.s32 %v6473_v23, %v2941_v45  ;;  %vm3036_vm5 = vmand %vm2905_vm14, %vm3004_vm11  ;;  %v2875_v18 = vpop.permute.xlu0 %2874 }
 0x376   : > { %v4686_v7 = vpop.eup %4685  ;;  %v3129_v14 = vadd.f32 %v3128_v41, %v3098_v0  ;;  %v2778_v49 = vadd.f32 %v2742_v1, %v7201_v3  ;;  %v3099_v51 = vsel %vm3035_vm7, %v3067_v52, 0.0  ;;  %v2943_v9 = vadd.s32 248, %v6470_v57  ;;  %vm3037_vm6 = vmand %vm2906_vm15, %vm3005_vm8 }
 0x377   : > { %v4688_v35 = vpop.eup %4687  ;;  %v3068_v5 = vsub.f32 %v2777_v12, %v7202_v59  ;;  %v2744_v53 = vmul.f32 0.6931472, %v4686_v7  ;;  %vm3006_vm13 = vcmp.lt.s32.totalorder %v2974_v48, 320  ;;  %vm2907_vm3 = vcmp.eq.s32.totalorder %v7204_v20, %v5183_v47 }
 0x378   : > { %v3130_v21 = vadd.f32 %v3129_v14, %v3099_v51  ;;  %v3069_v56 = vsub.f32 %v2778_v49, %v7203_v11  ;;  %v2746_v60 = vmul.f32 0.6931472, %v4688_v35  ;;  %v2976_v36 = vadd.s32 %v6473_v23, %v2942_v32  ;;  %vm3038_vm8 = vmand %vm2907_vm3, %vm3006_vm13 }
 0x379   : > { %v3100_v25 = vsel %vm3036_vm5, %v3068_v5, 0.0  ;;  %v2779_v44 = vadd.f32 %v2744_v53, %v7205_v19  ;;  %vm3007_vm12 = vcmp.lt.s32.totalorder %v2975_v28, 320  ;;  %vm2908_vm0 = vcmp.eq.s32.totalorder %v7206_v61, %v5183_v47 }
 0x37a   : > { %v4690_v6 = vpop.eup %4689  ;;  %v3131_v46 = vadd.f32 %v3130_v21, %v3100_v25  ;;  %v2780_v54 = vadd.f32 %v2746_v60, %v7207_v10  ;;  %v3101_v37 = vsel %vm3037_vm6, %v3069_v56, 0.0  ;;  %v2977_v24 = vadd.s32 %v6473_v23, %v2943_v9  ;;  %vm3039_vm2 = vmand %vm2908_vm0, %vm3007_vm12  ;;  %v7211_v23 = vld [vmem:[#allocation56_spill] sm:$0xff] }
 0x37b   : > { %v4692_v8 = vpop.eup %4691  ;;  %v3070_v15 = vsub.f32 %v2779_v44, %v7208_v27  ;;  %v2748_v40 = vmul.f32 0.6931472, %v4690_v6  ;;  %vm3008_vm9 = vcmp.lt.s32.totalorder %v2976_v36, 320  ;;  %vm2909_vm1 = vcmp.eq.s32.totalorder %v2875_v18, %v5183_v47 }
 0x37c   : > { %v3071_v39 = vsub.f32 %v2780_v54, %v7209_v58  ;;  %v2750_v55 = vmul.f32 0.6931472, %v4692_v8  ;;  %v3132_v2 = vadd.f32 %v3131_v46, %v3101_v37  ;;  %vm3009_vm10 = vcmp.lt.s32.totalorder %v2977_v24, 320  ;;  %vm3040_vm4 = vmand %vm2909_vm1, %vm3008_vm9 }
 0x37d   : > { %v2781_v50 = vadd.f32 %v2748_v40, %v7210_v31  ;;  %v3102_v17 = vsel %vm3038_vm8, %v3070_v15, 0.0  ;;  %vm2910_vm11 = vcmp.eq.s32.totalorder %v2878_v16, %v5183_v47  ;;  %vm3143_vm7 = vcmp.eq.s32.totalorder %v6470_v57, 0 }
 0x37e   : > { %v2782_v62 = vadd.f32 %v2750_v55, %v7211_v23  ;;  %v3133_v45 = vadd.f32 %v3132_v2, %v3102_v17  ;;  %v3103_v63 = vsel %vm3039_vm2, %v3071_v39, 0.0  ;;  %vm3041_vm14 = vmand %vm2910_vm11, %vm3009_vm10 }
 0x37f   : > { %v3072_v29 = vsub.f32 %v2781_v50, %v7212_v26 }
 0x380   : > { %v3073_v38 = vsub.f32 %v2782_v62, %v7213_v34  ;;  %v3134_v22 = vadd.f32 %v3133_v45, %v3103_v63 }
 0x381   : > { %v3104_v43 = vsel %vm3040_vm4, %v3072_v29, 0.0 }
 0x382   : > { %v3135_v4 = vadd.f32 %v3134_v22, %v3104_v43  ;;  %v3105_v48 = vsel %vm3041_vm14, %v3073_v38, 0.0 }
 0x384   : > { %v3136_v41 = vadd.f32 %v3135_v4, %v3105_v48 }
 0x386   : > { %v3137_v30 = vrot.slane %v3136_v41, 4 }
 0x388   : > { %v3138_v52 = vadd.f32 %v3137_v30, %v3136_v41 }
 0x38a   : > { %v3139_v1 = vrot.slane %v3138_v52, 2 }
 0x38c   : > { %v3140_v33 = vadd.f32 %v3139_v1, %v3138_v52 }
 0x38e   : > { %v3141_v47 = vrot.slane %v3140_v33, 1 }
 0x390   : > { %v3142_v0 = vadd.f32 %v3141_v47, %v3140_v33 }
 0x392   : > { %v3144_v13 = vsel %vm3143_vm7, %v3142_v0, 0.0 }
 0x393   : > { %3145 = vst [vmem:[%s182_s5] sm:$0xff] %v3144_v13 }
 0x394 PF: > { %p4522_p1 = scmp.ge.s32.totalorder %s4755_s15, 2  ;;  %s3182_s6 = sand.u32 1, %s4743_s12  }
 0x395   : > { %s3183_s7 = scalar_lea.sflag [#allocation3], %s3182_s6 }
 0x396   : > { %p4519_p2 = pnand %p4522_p1, %p4826_p6 }
 0x398   : > { %4738 = dma.done.wait (!%p4519_p2), %s3183_s7, 4096  }
 0x399   : > { %4740 = vsyncadd (!%p4519_p2), %s3183_s7, 4294963200  ;;  %p14_p3 = scmp.ge.s32.totalorder %s4809_s18, 4   ;;  %s7214_s12 = smov %s4747_s13 }
 0x39a   : > { %s7215_s13 = smov %s4751_s14  ;;  %s7216_s14 = smov %s4820_s21 }
 0x39b   : > { %s7217_s15 = smov %s4809_s18  ;;  %16 = sbr.rel (!%p14_p3) target bundleno = 3 (0x3), region = 75 }
 0x3a2   :  { %3195 = vsyncpa [#allocation3], 1 }
 0x3a3   :  { %3197 = vsyncpa [#allocation3 + $0x1], 1 }

</bundles_post_ra>
